<compile_context>
chip_gen: v5e
topology: v5e:2x2
jax: 0.10.0
libtpu: 0.0.40
codegen_flags: <defaults>
</compile_context>

<pallas_src>
import functools

import jax
import jax.numpy as jnp
from jax.experimental import pallas as pl
from jax.experimental.pallas import tpu as pltpu

DPAD = 128                       # lane-dense padded feature/class width (TPU lane count)
BN_EPS = 1e-5                    # torch BatchNorm1d default
MXU_DTYPE = jnp.bfloat16         # MXU input dtype; accumulation is always f32
VMEM_LIMIT = 32 * 1024 * 1024    # safe scoped-VMEM budget on v5e/v6e/v7x at these sizes


# ------------------------------- spec helpers ------------------------------- #

def _fullspec(shape):
    """Whole-array block (block shape == array shape); works for any grid arity."""
    n = len(shape)
    return pl.BlockSpec(shape, lambda *_, _n=n: (0,) * _n)


# --------------------------- in-kernel math helpers -------------------------- #

def _bn(h, gamma, beta):
    # Train-mode BatchNorm1d: biased batch statistics over the node axis (f32, XLU+VPU).
    # TODO(synk): running statistics are not tracked (forward-only, train-mode semantics).
    mean = jnp.mean(h, axis=0, keepdims=True)
    var = jnp.mean(jnp.square(h - mean), axis=0, keepdims=True)
    return (h - mean) * jax.lax.rsqrt(var + BN_EPS) * gamma + beta


def _linear(h, w_ref, b_ref):
    # MXU matmul with bf16 inputs / f32 accumulation; bias add in f32 (VPU).
    return jnp.dot(h.astype(MXU_DTYPE), w_ref[...].astype(MXU_DTYPE),
                   preferred_element_type=jnp.float32) + b_ref[...]


def _activate(y, act):
    if act == "leaky_relu":
        return jnp.where(y > 0, y, 0.01 * y)
    if act == "tanh":
        return jnp.tanh(y)
    if act == "elu":
        # Gate exp to the negative branch so large positives never hit inf on the EUP.
        return jnp.where(y > 0, y, jnp.expm1(jnp.minimum(y, 0.0)))
    return jnp.maximum(y, 0.0)   # 'relu' and the torch module's default branch


# ------------------------- fused GIN layer (one call) ------------------------ #

def make_gin_layer_kernel(n_lin, act):
    """Fused GINConv + MLP + ApplyNodeFunc BN/ReLU + outer BN/act kernel."""
    n_bn = max(n_lin - 1, 0)

    def kernel(eps_ref, adj_ref, x_ref, *refs):
        o_ref = refs[-1]
        refs = refs[:-1]
        Ws = refs[0:n_lin]
        Bs = refs[n_lin:2 * n_lin]
        Gs = refs[2 * n_lin:2 * n_lin + n_bn]
        Bts = refs[2 * n_lin + n_bn:2 * n_lin + 2 * n_bn]
        apply_g, apply_b, out_g, out_b = refs[2 * n_lin + 2 * n_bn:]

        x = x_ref[...]                                      # f32 [N, DPAD]

        # GINConv sum aggregation: adj @ x + (1 + eps) * x  (MXU bf16-in / f32-acc + VPU)
        h = jnp.dot(adj_ref[...], x.astype(MXU_DTYPE),
                    preferred_element_type=jnp.float32)
        h = h + eps_ref[0] * x                              # eps_ref holds (1 + eps), SMEM

        # MLP: (linear -> BN -> ReLU) * (n_lin - 1) -> linear   (all VMEM-resident)
        for i in range(n_lin - 1):
            h = _linear(h, Ws[i], Bs[i])
            h = jnp.maximum(_bn(h, Gs[i][...], Bts[i][...]), 0.0)
        h = _linear(h, Ws[n_lin - 1], Bs[n_lin - 1])

        # ApplyNodeFunc: BN -> ReLU
        h = jnp.maximum(_bn(h, apply_g[...], apply_b[...]), 0.0)
        # GIN outer BN + activation
        h = _activate(_bn(h, out_g[...], out_b[...]), act)

        o_ref[...] = h

    return kernel


def pallas_gin_layer(adj_b, x, lp, act):
    n_nodes = x.shape[0]
    mlp = lp["mlp"]
    n_lin = len(mlp["W"])
    kernel = make_gin_layer_kernel(n_lin=n_lin, act=act)

    dense_ops = ([adj_b, x] + list(mlp["W"]) + list(mlp["b"])
                 + list(mlp["bn_gamma"]) + list(mlp["bn_beta"])
                 + [lp["apply_bn"][0], lp["apply_bn"][1],
                    lp["out_bn"][0], lp["out_bn"][1]])

    in_specs = ([pl.BlockSpec(memory_space=pltpu.MemorySpace.SMEM)]   # (1+eps) scalar
                + [_fullspec(op.shape) for op in dense_ops])
    out_dim = mlp["W"][-1].shape[1]                                   # == DPAD

    return pl.pallas_call(
        kernel,
        grid=(1,),
        in_specs=in_specs,
        out_specs=_fullspec((n_nodes, out_dim)),
        out_shape=jax.ShapeDtypeStruct((n_nodes, out_dim), jnp.float32),
        compiler_params=pltpu.CompilerParams(
            dimension_semantics=("arbitrary",),
            vmem_limit_bytes=VMEM_LIMIT),
    )(lp["one_plus_eps"], *dense_ops)


# ------------------- fused prediction head (pool + linear + sum) ------------- #

def _pred_head_kernel(pool_ref, h_ref, w_ref, b_ref, o_ref):
    @pl.when(pl.program_id(0) == 0)
    def _():
        o_ref[...] = jnp.zeros_like(o_ref)

    # Graph sum pooling: pool @ h_l   (bf16 MXU, f32 accumulate)
    pooled = jnp.dot(pool_ref[...], h_ref[...],
                     preferred_element_type=jnp.float32)              # [G, DPAD] f32
    # Per-layer prediction linear, accumulated into the resident f32 output.
    score = jnp.dot(pooled.astype(MXU_DTYPE), w_ref[...].astype(MXU_DTYPE),
                    preferred_element_type=jnp.float32) + b_ref[...]
    # TODO(synk): nn.Dropout(final_dropout) on the prediction head is identity (eval mode).
    o_ref[...] += score


def pallas_pred_head(pool_b, hidden_rep, pred_W, pred_b):
    n_layers = len(hidden_rep)
    n_graphs, n_nodes = pool_b.shape
    h_stack = jnp.stack(hidden_rep).astype(MXU_DTYPE)   # [L, N, DPAD]  (halves HBM bytes)
    w_stack = jnp.stack(pred_W)                         # [L, DPAD, DPAD]
    b_stack = jnp.stack(pred_b)                         # [L, 1, DPAD]

    return pl.pallas_call(
        _pred_head_kernel,
        grid=(n_layers,),
        in_specs=[
            pl.BlockSpec((n_graphs, n_nodes), lambda l: (0, 0)),
            pl.BlockSpec((None, n_nodes, DPAD), lambda l: (l, 0, 0)),
            pl.BlockSpec((None, DPAD, DPAD), lambda l: (l, 0, 0)),
            pl.BlockSpec((None, 1, DPAD), lambda l: (l, 0, 0)),
        ],
        out_specs=pl.BlockSpec((n_graphs, DPAD), lambda l: (0, 0)),   # resident accumulator
        out_shape=jax.ShapeDtypeStruct((n_graphs, DPAD), jnp.float32),
        compiler_params=pltpu.CompilerParams(
            dimension_semantics=("arbitrary",),
            vmem_limit_bytes=VMEM_LIMIT),
    )(pool_b, h_stack, w_stack, b_stack)


# --------------------------- parameter construction -------------------------- #

def _pad2(a, rows, cols):
    out = jnp.zeros((rows, cols), jnp.float32)
    return out.at[:a.shape[0], :a.shape[1]].set(a)


def init_linear(key, fan_in, fan_out):
    # torch.nn.Linear default init U(-1/sqrt(fan_in), 1/sqrt(fan_in)); zero-pad to 128 lanes.
    k1, k2 = jax.random.split(key)
    bound = 1.0 / (fan_in ** 0.5)
    w = jax.random.uniform(k1, (fan_in, fan_out), jnp.float32, -bound, bound)
    b = jax.random.uniform(k2, (1, fan_out), jnp.float32, -bound, bound)
    return _pad2(w, DPAD, DPAD), _pad2(b, 1, DPAD)


def init_bn(dim):
    # torch BatchNorm1d affine defaults; padded lanes get gamma=0, beta=0 so they stay zero.
    gamma = _pad2(jnp.ones((1, dim), jnp.float32), 1, DPAD)
    beta = jnp.zeros((1, DPAD), jnp.float32)
    return gamma, beta


def init_gin_params(key, features_num, hidden, num_class, mlp_layers):
    assert features_num <= DPAD and num_class <= DPAD and max(hidden) <= DPAD
    num_layers = len(hidden) + 1           # GIN.num_layers
    keys = jax.random.split(key, 64)
    ki = iter(range(64))

    gin_layers = []
    for layer in range(num_layers - 1):
        in_dim = features_num if layer == 0 else hidden[layer - 1]
        h_dim = hidden[layer]
        Ws, Bs, bn_g, bn_b = [], [], [], []
        if mlp_layers == 1:
            w, b = init_linear(keys[next(ki)], in_dim, h_dim)
            Ws.append(w); Bs.append(b)
        else:
            w, b = init_linear(keys[next(ki)], in_dim, h_dim)
            Ws.append(w); Bs.append(b)
            for _ in range(mlp_layers - 2):
                w, b = init_linear(keys[next(ki)], h_dim, h_dim)
                Ws.append(w); Bs.append(b)
            w, b = init_linear(keys[next(ki)], h_dim, h_dim)
            Ws.append(w); Bs.append(b)
            for _ in range(mlp_layers - 1):
                g, bb = init_bn(h_dim)
                bn_g.append(g); bn_b.append(bb)
        gin_layers.append(dict(
            one_plus_eps=jnp.array([1.0 + 0.0], jnp.float32),  # GINConv init_eps = 0 (SMEM)
            mlp=dict(W=Ws, b=Bs, bn_gamma=bn_g, bn_beta=bn_b),
            apply_bn=init_bn(h_dim),          # ApplyNodeFunc.bn
            out_bn=init_bn(h_dim),            # GIN.batch_norms[layer]
        ))

    pred_W, pred_b = [], []
    for layer in range(num_layers):
        in_dim = features_num if layer == 0 else hidden[layer - 1]
        w, b = init_linear(keys[next(ki)], in_dim, num_class)
        pred_W.append(w); pred_b.append(b)

    return dict(gin_layers=gin_layers, pred_W=pred_W, pred_b=pred_b)


# ----------------------------------- forward --------------------------------- #

def gin_forward(x, adj, pool_mat, params, act="relu", num_class=None):
    """GIN.forward: per-graph class scores [G, num_class]."""
    n_nodes, f_real = x.shape
    # Pad features to lane-dense width once at the boundary; cast 0/1 matrices to bf16
    # (lossless) so the N x N adjacency halves its HBM traffic into the MXU.
    x_p = jnp.zeros((n_nodes, DPAD), jnp.float32).at[:, :f_real].set(x)
    adj_b = adj.astype(MXU_DTYPE)
    pool_b = pool_mat.astype(MXU_DTYPE)

    hidden_rep = [x_p]
    h = x_p
    for lp in params["gin_layers"]:
        h = pallas_gin_layer(adj_b, h, lp, act=act)      # one fused kernel per GIN layer
        hidden_rep.append(h)

    score_pad = pallas_pred_head(pool_b, hidden_rep,
                                 params["pred_W"], params["pred_b"])   # [G, 128]
    return score_pad[:, :num_class]                      # slice padded lanes outside Pallas


# ------------------------------------- main ----------------------------------- #

if __name__ == "__main__":
    # Model hyperparameters (args dict of the PyTorch GIN module)
    features_num = 8
    hidden = [16, 16]          # num_layers = 3 (> 2 as asserted by the module)
    num_class = 4
    mlp_layers = 2
    act = "relu"

    # Synthetic graph batch: N nodes split evenly across G graphs
    N, G = 256, 8
    key = jax.random.PRNGKey(0)
    k_adj, k_x, k_params = jax.random.split(key, 3)

    x = jax.random.normal(k_x, (N, features_num), jnp.float32)

    adj = (jax.random.uniform(k_adj, (N, N)) < 0.05).astype(jnp.float32)
    adj = jnp.maximum(adj, adj.T) * (1.0 - jnp.eye(N, dtype=jnp.float32))

    graph_ids = jnp.arange(N) // (N // G)
    pool_mat = (graph_ids[None, :] == jnp.arange(G)[:, None]).astype(jnp.float32)

    params = init_gin_params(k_params, features_num, hidden, num_class, mlp_layers)

    fwd = jax.jit(functools.partial(gin_forward, act=act, num_class=num_class))
    out = fwd(x, adj, pool_mat, params)
    out = jax.block_until_ready(out)
    assert out.shape == (G, num_class)
    print("KERNEL_OK")
</pallas_src>

<mosaic_0001>
module attributes {stable_mosaic.version = 11 : i64} {
  func.func @kernel(%arg0: i32, %arg1: memref<1xf32, #tpu.memory_space<smem>>, %arg2: memref<256x256xbf16, #tpu.memory_space<vmem>>, %arg3: memref<256x128xf32, #tpu.memory_space<vmem>>, %arg4: memref<128x128xf32, #tpu.memory_space<vmem>>, %arg5: memref<128x128xf32, #tpu.memory_space<vmem>>, %arg6: memref<1x128xf32, #tpu.memory_space<vmem>>, %arg7: memref<1x128xf32, #tpu.memory_space<vmem>>, %arg8: memref<1x128xf32, #tpu.memory_space<vmem>>, %arg9: memref<1x128xf32, #tpu.memory_space<vmem>>, %arg10: memref<1x128xf32, #tpu.memory_space<vmem>>, %arg11: memref<1x128xf32, #tpu.memory_space<vmem>>, %arg12: memref<1x128xf32, #tpu.memory_space<vmem>>, %arg13: memref<1x128xf32, #tpu.memory_space<vmem>>, %arg14: memref<256x128xf32, #tpu.memory_space<vmem>>) attributes {dimension_semantics = [#tpu.dimension_semantics<arbitrary>], iteration_bounds = array<i64: 1>, scalar_prefetch = 0 : i64, scratch_operands = 0 : i64, tpu.core_type = #tpu.core_type<tc>, window_params = [{transform_indices = @transform_0, window_bounds = array<i64: 1>}, {pipeline_mode = #tpu.pipeline_mode<synchronous>, transform_indices = @transform_1, window_bounds = array<i64: 256, 256>}, {pipeline_mode = #tpu.pipeline_mode<synchronous>, transform_indices = @transform_2, window_bounds = array<i64: 256, 128>}, {pipeline_mode = #tpu.pipeline_mode<synchronous>, transform_indices = @transform_3, window_bounds = array<i64: 128, 128>}, {pipeline_mode = #tpu.pipeline_mode<synchronous>, transform_indices = @transform_4, window_bounds = array<i64: 128, 128>}, {pipeline_mode = #tpu.pipeline_mode<synchronous>, transform_indices = @transform_5, window_bounds = array<i64: 1, 128>}, {pipeline_mode = #tpu.pipeline_mode<synchronous>, transform_indices = @transform_6, window_bounds = array<i64: 1, 128>}, {pipeline_mode = #tpu.pipeline_mode<synchronous>, transform_indices = @transform_7, window_bounds = array<i64: 1, 128>}, {pipeline_mode = #tpu.pipeline_mode<synchronous>, transform_indices = @transform_8, window_bounds = array<i64: 1, 128>}, {pipeline_mode = #tpu.pipeline_mode<synchronous>, transform_indices = @transform_9, window_bounds = array<i64: 1, 128>}, {pipeline_mode = #tpu.pipeline_mode<synchronous>, transform_indices = @transform_10, window_bounds = array<i64: 1, 128>}, {pipeline_mode = #tpu.pipeline_mode<synchronous>, transform_indices = @transform_11, window_bounds = array<i64: 1, 128>}, {pipeline_mode = #tpu.pipeline_mode<synchronous>, transform_indices = @transform_12, window_bounds = array<i64: 1, 128>}, {pipeline_mode = #tpu.pipeline_mode<synchronous>, transform_indices = @transform_13, window_bounds = array<i64: 256, 128>}]} {
    %c0 = arith.constant 0 : index
    %c0_0 = arith.constant 0 : index
    %0 = vector.load %arg3[%c0, %c0_0] : memref<256x128xf32, #tpu.memory_space<vmem>>, vector<256x128xf32>
    %c0_1 = arith.constant 0 : index
    %c0_2 = arith.constant 0 : index
    %1 = vector.load %arg2[%c0_1, %c0_2] : memref<256x256xbf16, #tpu.memory_space<vmem>>, vector<256x256xbf16>
    %2 = arith.truncf %0 : vector<256x128xf32> to vector<256x128xbf16>
    %cst = arith.constant dense<0.000000e+00> : vector<256x128xf32>
    %3 = tpu.matmul %1, %2, %cst {dimension_numbers = #tpu.dot_dimension_numbers<[1], [0], [0], [1], [0, 0, 1, 1], [], []>} : vector<256x256xbf16>, vector<256x128xbf16>, vector<256x128xf32> -> vector<256x128xf32>
    %c0_3 = arith.constant 0 : index
    %4 = memref.load %arg1[%c0_3] : memref<1xf32, #tpu.memory_space<smem>>
    %5 = vector.broadcast %4 : f32 to vector<256x128xf32>
    %6 = arith.mulf %5, %0 : vector<256x128xf32>
    %7 = arith.addf %3, %6 : vector<256x128xf32>
    %8 = arith.truncf %7 : vector<256x128xf32> to vector<256x128xbf16>
    %c0_4 = arith.constant 0 : index
    %c0_5 = arith.constant 0 : index
    %9 = vector.load %arg4[%c0_4, %c0_5] : memref<128x128xf32, #tpu.memory_space<vmem>>, vector<128x128xf32>
    %10 = arith.truncf %9 : vector<128x128xf32> to vector<128x128xbf16>
    %cst_6 = arith.constant dense<0.000000e+00> : vector<256x128xf32>
    %11 = tpu.matmul %8, %10, %cst_6 {dimension_numbers = #tpu.dot_dimension_numbers<[1], [0], [0], [1], [0, 0, 1, 1], [], []>} : vector<256x128xbf16>, vector<128x128xbf16>, vector<256x128xf32> -> vector<256x128xf32>
    %c0_7 = arith.constant 0 : index
    %c0_8 = arith.constant 0 : index
    %12 = vector.load %arg6[%c0_7, %c0_8] : memref<1x128xf32, #tpu.memory_space<vmem>>, vector<1x128xf32>
    %13 = vector.broadcast %12 : vector<1x128xf32> to vector<256x128xf32>
    %14 = arith.addf %11, %13 : vector<256x128xf32>
    %c0_9 = arith.constant 0 : index
    %c0_10 = arith.constant 0 : index
    %15 = vector.load %arg8[%c0_9, %c0_10] : memref<1x128xf32, #tpu.memory_space<vmem>>, vector<1x128xf32>
    %c0_11 = arith.constant 0 : index
    %c0_12 = arith.constant 0 : index
    %16 = vector.load %arg9[%c0_11, %c0_12] : memref<1x128xf32, #tpu.memory_space<vmem>>, vector<1x128xf32>
    %cst_13 = arith.constant dense<0.000000e+00> : vector<128xf32>
    %17 = vector.multi_reduction <add>, %14, %cst_13 [0] : vector<256x128xf32> to vector<128xf32>
    %18 = vector.shape_cast %17 : vector<128xf32> to vector<1x128xf32>
    %cst_14 = arith.constant 2.560000e+02 : f32
    %19 = vector.broadcast %cst_14 : f32 to vector<1x128xf32>
    %20 = arith.divf %18, %19 : vector<1x128xf32>
    %21 = vector.broadcast %20 : vector<1x128xf32> to vector<256x128xf32>
    %22 = arith.subf %14, %21 : vector<256x128xf32>
    %23 = arith.mulf %22, %22 : vector<256x128xf32>
    %cst_15 = arith.constant dense<0.000000e+00> : vector<128xf32>
    %24 = vector.multi_reduction <add>, %23, %cst_15 [0] : vector<256x128xf32> to vector<128xf32>
    %25 = vector.shape_cast %24 : vector<128xf32> to vector<1x128xf32>
    %cst_16 = arith.constant 2.560000e+02 : f32
    %26 = vector.broadcast %cst_16 : f32 to vector<1x128xf32>
    %27 = arith.divf %25, %26 : vector<1x128xf32>
    %28 = vector.broadcast %20 : vector<1x128xf32> to vector<256x128xf32>
    %29 = arith.subf %14, %28 : vector<256x128xf32>
    %cst_17 = arith.constant 9.99999974E-6 : f32
    %30 = vector.broadcast %cst_17 : f32 to vector<1x128xf32>
    %31 = arith.addf %27, %30 : vector<1x128xf32>
    %32 = math.rsqrt %31 : vector<1x128xf32>
    %33 = vector.broadcast %32 : vector<1x128xf32> to vector<256x128xf32>
    %34 = arith.mulf %29, %33 : vector<256x128xf32>
    %35 = vector.broadcast %15 : vector<1x128xf32> to vector<256x128xf32>
    %36 = arith.mulf %34, %35 : vector<256x128xf32>
    %37 = vector.broadcast %16 : vector<1x128xf32> to vector<256x128xf32>
    %38 = arith.addf %36, %37 : vector<256x128xf32>
    %cst_18 = arith.constant 0.000000e+00 : f32
    %39 = vector.broadcast %cst_18 : f32 to vector<256x128xf32>
    %40 = arith.maximumf %38, %39 : vector<256x128xf32>
    %41 = arith.truncf %40 : vector<256x128xf32> to vector<256x128xbf16>
    %c0_19 = arith.constant 0 : index
    %c0_20 = arith.constant 0 : index
    %42 = vector.load %arg5[%c0_19, %c0_20] : memref<128x128xf32, #tpu.memory_space<vmem>>, vector<128x128xf32>
    %43 = arith.truncf %42 : vector<128x128xf32> to vector<128x128xbf16>
    %cst_21 = arith.constant dense<0.000000e+00> : vector<256x128xf32>
    %44 = tpu.matmul %41, %43, %cst_21 {dimension_numbers = #tpu.dot_dimension_numbers<[1], [0], [0], [1], [0, 0, 1, 1], [], []>} : vector<256x128xbf16>, vector<128x128xbf16>, vector<256x128xf32> -> vector<256x128xf32>
    %c0_22 = arith.constant 0 : index
    %c0_23 = arith.constant 0 : index
    %45 = vector.load %arg7[%c0_22, %c0_23] : memref<1x128xf32, #tpu.memory_space<vmem>>, vector<1x128xf32>
    %46 = vector.broadcast %45 : vector<1x128xf32> to vector<256x128xf32>
    %47 = arith.addf %44, %46 : vector<256x128xf32>
    %c0_24 = arith.constant 0 : index
    %c0_25 = arith.constant 0 : index
    %48 = vector.load %arg10[%c0_24, %c0_25] : memref<1x128xf32, #tpu.memory_space<vmem>>, vector<1x128xf32>
    %c0_26 = arith.constant 0 : index
    %c0_27 = arith.constant 0 : index
    %49 = vector.load %arg11[%c0_26, %c0_27] : memref<1x128xf32, #tpu.memory_space<vmem>>, vector<1x128xf32>
    %cst_28 = arith.constant dense<0.000000e+00> : vector<128xf32>
    %50 = vector.multi_reduction <add>, %47, %cst_28 [0] : vector<256x128xf32> to vector<128xf32>
    %51 = vector.shape_cast %50 : vector<128xf32> to vector<1x128xf32>
    %cst_29 = arith.constant 2.560000e+02 : f32
    %52 = vector.broadcast %cst_29 : f32 to vector<1x128xf32>
    %53 = arith.divf %51, %52 : vector<1x128xf32>
    %54 = vector.broadcast %53 : vector<1x128xf32> to vector<256x128xf32>
    %55 = arith.subf %47, %54 : vector<256x128xf32>
    %56 = arith.mulf %55, %55 : vector<256x128xf32>
    %cst_30 = arith.constant dense<0.000000e+00> : vector<128xf32>
    %57 = vector.multi_reduction <add>, %56, %cst_30 [0] : vector<256x128xf32> to vector<128xf32>
    %58 = vector.shape_cast %57 : vector<128xf32> to vector<1x128xf32>
    %cst_31 = arith.constant 2.560000e+02 : f32
    %59 = vector.broadcast %cst_31 : f32 to vector<1x128xf32>
    %60 = arith.divf %58, %59 : vector<1x128xf32>
    %61 = vector.broadcast %53 : vector<1x128xf32> to vector<256x128xf32>
    %62 = arith.subf %47, %61 : vector<256x128xf32>
    %cst_32 = arith.constant 9.99999974E-6 : f32
    %63 = vector.broadcast %cst_32 : f32 to vector<1x128xf32>
    %64 = arith.addf %60, %63 : vector<1x128xf32>
    %65 = math.rsqrt %64 : vector<1x128xf32>
    %66 = vector.broadcast %65 : vector<1x128xf32> to vector<256x128xf32>
    %67 = arith.mulf %62, %66 : vector<256x128xf32>
    %68 = vector.broadcast %48 : vector<1x128xf32> to vector<256x128xf32>
    %69 = arith.mulf %67, %68 : vector<256x128xf32>
    %70 = vector.broadcast %49 : vector<1x128xf32> to vector<256x128xf32>
    %71 = arith.addf %69, %70 : vector<256x128xf32>
    %cst_33 = arith.constant 0.000000e+00 : f32
    %72 = vector.broadcast %cst_33 : f32 to vector<256x128xf32>
    %73 = arith.maximumf %71, %72 : vector<256x128xf32>
    %c0_34 = arith.constant 0 : index
    %c0_35 = arith.constant 0 : index
    %74 = vector.load %arg12[%c0_34, %c0_35] : memref<1x128xf32, #tpu.memory_space<vmem>>, vector<1x128xf32>
    %c0_36 = arith.constant 0 : index
    %c0_37 = arith.constant 0 : index
    %75 = vector.load %arg13[%c0_36, %c0_37] : memref<1x128xf32, #tpu.memory_space<vmem>>, vector<1x128xf32>
    %cst_38 = arith.constant dense<0.000000e+00> : vector<128xf32>
    %76 = vector.multi_reduction <add>, %73, %cst_38 [0] : vector<256x128xf32> to vector<128xf32>
    %77 = vector.shape_cast %76 : vector<128xf32> to vector<1x128xf32>
    %cst_39 = arith.constant 2.560000e+02 : f32
    %78 = vector.broadcast %cst_39 : f32 to vector<1x128xf32>
    %79 = arith.divf %77, %78 : vector<1x128xf32>
    %80 = vector.broadcast %79 : vector<1x128xf32> to vector<256x128xf32>
    %81 = arith.subf %73, %80 : vector<256x128xf32>
    %82 = arith.mulf %81, %81 : vector<256x128xf32>
    %cst_40 = arith.constant dense<0.000000e+00> : vector<128xf32>
    %83 = vector.multi_reduction <add>, %82, %cst_40 [0] : vector<256x128xf32> to vector<128xf32>
    %84 = vector.shape_cast %83 : vector<128xf32> to vector<1x128xf32>
    %cst_41 = arith.constant 2.560000e+02 : f32
    %85 = vector.broadcast %cst_41 : f32 to vector<1x128xf32>
    %86 = arith.divf %84, %85 : vector<1x128xf32>
    %87 = vector.broadcast %79 : vector<1x128xf32> to vector<256x128xf32>
    %88 = arith.subf %73, %87 : vector<256x128xf32>
    %cst_42 = arith.constant 9.99999974E-6 : f32
    %89 = vector.broadcast %cst_42 : f32 to vector<1x128xf32>
    %90 = arith.addf %86, %89 : vector<1x128xf32>
    %91 = math.rsqrt %90 : vector<1x128xf32>
    %92 = vector.broadcast %91 : vector<1x128xf32> to vector<256x128xf32>
    %93 = arith.mulf %88, %92 : vector<256x128xf32>
    %94 = vector.broadcast %74 : vector<1x128xf32> to vector<256x128xf32>
    %95 = arith.mulf %93, %94 : vector<256x128xf32>
    %96 = vector.broadcast %75 : vector<1x128xf32> to vector<256x128xf32>
    %97 = arith.addf %95, %96 : vector<256x128xf32>
    %cst_43 = arith.constant 0.000000e+00 : f32
    %98 = vector.broadcast %cst_43 : f32 to vector<256x128xf32>
    %99 = arith.maximumf %97, %98 : vector<256x128xf32>
    %c0_44 = arith.constant 0 : index
    %c0_45 = arith.constant 0 : index
    %100 = vector.load %arg14[%c0_44, %c0_45] : memref<256x128xf32, #tpu.memory_space<vmem>>, vector<256x128xf32>
    tpu.vector_store %arg14[%c0_44, %c0_45], %99 {strides = array<i32>} : memref<256x128xf32, #tpu.memory_space<vmem>>, vector<256x128xf32>,
    return
  }
  func.func @transform_0(%arg0: i32) -> i32 {
    %c0_i32 = arith.constant 0 : i32
    %c0_i32_0 = arith.constant 0 : i32
    return %c0_i32 : i32
  }
  func.func @transform_1(%arg0: i32) -> (i32, i32) {
    %c0_i32 = arith.constant 0 : i32
    %c0_i32_0 = arith.constant 0 : i32
    %c0_i32_1 = arith.constant 0 : i32
    return %c0_i32, %c0_i32_0 : i32, i32
  }
  func.func @transform_2(%arg0: i32) -> (i32, i32) {
    %c0_i32 = arith.constant 0 : i32
    %c0_i32_0 = arith.constant 0 : i32
    %c0_i32_1 = arith.constant 0 : i32
    return %c0_i32, %c0_i32_0 : i32, i32
  }
  func.func @transform_3(%arg0: i32) -> (i32, i32) {
    %c0_i32 = arith.constant 0 : i32
    %c0_i32_0 = arith.constant 0 : i32
    %c0_i32_1 = arith.constant 0 : i32
    return %c0_i32, %c0_i32_0 : i32, i32
  }
  func.func @transform_4(%arg0: i32) -> (i32, i32) {
    %c0_i32 = arith.constant 0 : i32
    %c0_i32_0 = arith.constant 0 : i32
    %c0_i32_1 = arith.constant 0 : i32
    return %c0_i32, %c0_i32_0 : i32, i32
  }
  func.func @transform_5(%arg0: i32) -> (i32, i32) {
    %c0_i32 = arith.constant 0 : i32
    %c0_i32_0 = arith.constant 0 : i32
    %c0_i32_1 = arith.constant 0 : i32
    return %c0_i32, %c0_i32_0 : i32, i32
  }
  func.func @transform_6(%arg0: i32) -> (i32, i32) {
    %c0_i32 = arith.constant 0 : i32
    %c0_i32_0 = arith.constant 0 : i32
    %c0_i32_1 = arith.constant 0 : i32
    return %c0_i32, %c0_i32_0 : i32, i32
  }
  func.func @transform_7(%arg0: i32) -> (i32, i32) {
    %c0_i32 = arith.constant 0 : i32
    %c0_i32_0 = arith.constant 0 : i32
    %c0_i32_1 = arith.constant 0 : i32
    return %c0_i32, %c0_i32_0 : i32, i32
  }
  func.func @transform_8(%arg0: i32) -> (i32, i32) {
    %c0_i32 = arith.constant 0 : i32
    %c0_i32_0 = arith.constant 0 : i32
    %c0_i32_1 = arith.constant 0 : i32
    return %c0_i32, %c0_i32_0 : i32, i32
  }
  func.func @transform_9(%arg0: i32) -> (i32, i32) {
    %c0_i32 = arith.constant 0 : i32
    %c0_i32_0 = arith.constant 0 : i32
    %c0_i32_1 = arith.constant 0 : i32
    return %c0_i32, %c0_i32_0 : i32, i32
  }
  func.func @transform_10(%arg0: i32) -> (i32, i32) {
    %c0_i32 = arith.constant 0 : i32
    %c0_i32_0 = arith.constant 0 : i32
    %c0_i32_1 = arith.constant 0 : i32
    return %c0_i32, %c0_i32_0 : i32, i32
  }
  func.func @transform_11(%arg0: i32) -> (i32, i32) {
    %c0_i32 = arith.constant 0 : i32
    %c0_i32_0 = arith.constant 0 : i32
    %c0_i32_1 = arith.constant 0 : i32
    return %c0_i32, %c0_i32_0 : i32, i32
  }
  func.func @transform_12(%arg0: i32) -> (i32, i32) {
    %c0_i32 = arith.constant 0 : i32
    %c0_i32_0 = arith.constant 0 : i32
    %c0_i32_1 = arith.constant 0 : i32
    return %c0_i32, %c0_i32_0 : i32, i32
  }
  func.func @transform_13(%arg0: i32) -> (i32, i32) {
    %c0_i32 = arith.constant 0 : i32
    %c0_i32_0 = arith.constant 0 : i32
    %c0_i32_1 = arith.constant 0 : i32
    return %c0_i32, %c0_i32_0 : i32, i32
  }
}

module attributes {stable_mosaic.version = 11 : i64} {
  func.func @_pred_head_kernel(%arg0: i32, %arg1: memref<8x256xbf16, #tpu.memory_space<vmem>>, %arg2: memref<1x256x128xbf16, #tpu.memory_space<vmem>>, %arg3: memref<1x128x128xf32, #tpu.memory_space<vmem>>, %arg4: memref<1x1x128xf32, #tpu.memory_space<vmem>>, %arg5: memref<8x128xf32, #tpu.memory_space<vmem>>) attributes {dimension_semantics = [#tpu.dimension_semantics<arbitrary>], iteration_bounds = array<i64: 3>, scalar_prefetch = 0 : i64, scratch_operands = 0 : i64, tpu.core_type = #tpu.core_type<tc>, window_params = [{pipeline_mode = #tpu.pipeline_mode<synchronous>, transform_indices = @transform_0, window_bounds = array<i64: 8, 256>}, {transform_indices = @transform_1, window_bounds = array<i64: 1, 256, 128>}, {transform_indices = @transform_2, window_bounds = array<i64: 1, 128, 128>}, {transform_indices = @transform_3, window_bounds = array<i64: 1, 1, 128>}, {pipeline_mode = #tpu.pipeline_mode<synchronous>, transform_indices = @transform_4, window_bounds = array<i64: 8, 128>}]} {
    %c0_i32 = arith.constant 0 : i32
    %0 = arith.cmpi eq, %arg0, %c0_i32 : i32
    %1 = arith.extui %0 : i1 to i32
    %c0_i32_0 = arith.constant 0 : i32
    %2 = arith.cmpi ne, %1, %c0_i32_0 : i32
    scf.if %2 {
      %cst_16 = arith.constant 0.000000e+00 : f32
      %19 = vector.broadcast %cst_16 : f32 to vector<8x128xf32>
      %c0_17 = arith.constant 0 : index
      %c0_18 = arith.constant 0 : index
      %20 = vector.load %arg5[%c0_17, %c0_18] : memref<8x128xf32, #tpu.memory_space<vmem>>, vector<8x128xf32>
      tpu.vector_store %arg5[%c0_17, %c0_18], %19 {strides = array<i32>} : memref<8x128xf32, #tpu.memory_space<vmem>>, vector<8x128xf32>,
    } else {
    }
    %c0 = arith.constant 0 : index
    %c0_1 = arith.constant 0 : index
    %3 = vector.load %arg1[%c0, %c0_1] : memref<8x256xbf16, #tpu.memory_space<vmem>>, vector<8x256xbf16>
    %c0_2 = arith.constant 0 : index
    %c0_3 = arith.constant 0 : index
    %c0_4 = arith.constant 0 : index
    %4 = vector.load %arg2[%c0_2, %c0_3, %c0_4] : memref<1x256x128xbf16, #tpu.memory_space<vmem>>, vector<1x256x128xbf16>
    %5 = vector.shape_cast %4 : vector<1x256x128xbf16> to vector<256x128xbf16>
    %cst = arith.constant dense<0.000000e+00> : vector<8x128xf32>
    %6 = tpu.matmul %3, %5, %cst {dimension_numbers = #tpu.dot_dimension_numbers<[1], [0], [0], [1], [0, 0, 1, 1], [], []>} : vector<8x256xbf16>, vector<256x128xbf16>, vector<8x128xf32> -> vector<8x128xf32>
    %7 = arith.truncf %6 : vector<8x128xf32> to vector<8x128xbf16>
    %c0_5 = arith.constant 0 : index
    %c0_6 = arith.constant 0 : index
    %c0_7 = arith.constant 0 : index
    %8 = vector.load %arg3[%c0_5, %c0_6, %c0_7] : memref<1x128x128xf32, #tpu.memory_space<vmem>>, vector<1x128x128xf32>
    %9 = vector.shape_cast %8 : vector<1x128x128xf32> to vector<128x128xf32>
    %10 = arith.truncf %9 : vector<128x128xf32> to vector<128x128xbf16>
    %cst_8 = arith.constant dense<0.000000e+00> : vector<8x128xf32>
    %11 = tpu.matmul %7, %10, %cst_8 {dimension_numbers = #tpu.dot_dimension_numbers<[1], [0], [0], [1], [0, 0, 1, 1], [], []>} : vector<8x128xbf16>, vector<128x128xbf16>, vector<8x128xf32> -> vector<8x128xf32>
    %c0_9 = arith.constant 0 : index
    %c0_10 = arith.constant 0 : index
    %c0_11 = arith.constant 0 : index
    %12 = vector.load %arg4[%c0_9, %c0_10, %c0_11] : memref<1x1x128xf32, #tpu.memory_space<vmem>>, vector<1x1x128xf32>
    %13 = vector.shape_cast %12 : vector<1x1x128xf32> to vector<1x128xf32>
    %14 = vector.broadcast %13 : vector<1x128xf32> to vector<8x128xf32>
    %15 = arith.addf %11, %14 : vector<8x128xf32>
    %c0_12 = arith.constant 0 : index
    %c0_13 = arith.constant 0 : index
    %16 = vector.load %arg5[%c0_12, %c0_13] : memref<8x128xf32, #tpu.memory_space<vmem>>, vector<8x128xf32>
    %17 = arith.addf %16, %15 : vector<8x128xf32>
    %c0_14 = arith.constant 0 : index
    %c0_15 = arith.constant 0 : index
    %18 = vector.load %arg5[%c0_14, %c0_15] : memref<8x128xf32, #tpu.memory_space<vmem>>, vector<8x128xf32>
    tpu.vector_store %arg5[%c0_14, %c0_15], %17 {strides = array<i32>} : memref<8x128xf32, #tpu.memory_space<vmem>>, vector<8x128xf32>,
    return
  }
  func.func @transform_0(%arg0: i32) -> (i32, i32) {
    %c0_i32 = arith.constant 0 : i32
    %c0_i32_0 = arith.constant 0 : i32
    %c0_i32_1 = arith.constant 0 : i32
    return %c0_i32, %c0_i32_0 : i32, i32
  }
  func.func @transform_1(%arg0: i32) -> (i32, i32, i32) {
    %c0_i32 = arith.constant 0 : i32
    %c0_i32_0 = arith.constant 0 : i32
    %c0_i32_1 = arith.constant 0 : i32
    return %arg0, %c0_i32, %c0_i32_0 : i32, i32, i32
  }
  func.func @transform_2(%arg0: i32) -> (i32, i32, i32) {
    %c0_i32 = arith.constant 0 : i32
    %c0_i32_0 = arith.constant 0 : i32
    %c0_i32_1 = arith.constant 0 : i32
    return %arg0, %c0_i32, %c0_i32_0 : i32, i32, i32
  }
  func.func @transform_3(%arg0: i32) -> (i32, i32, i32) {
    %c0_i32 = arith.constant 0 : i32
    %c0_i32_0 = arith.constant 0 : i32
    %c0_i32_1 = arith.constant 0 : i32
    return %arg0, %c0_i32, %c0_i32_0 : i32, i32, i32
  }
  func.func @transform_4(%arg0: i32) -> (i32, i32) {
    %c0_i32 = arith.constant 0 : i32
    %c0_i32_0 = arith.constant 0 : i32
    %c0_i32_1 = arith.constant 0 : i32
    return %c0_i32, %c0_i32_0 : i32, i32
  }
}

</mosaic_0001>

<bundles_post_ra>
// kernel: gin_forward.5
= control target key start
LH: loop header
LB: loop body
LE: loop exit
PB: predicated region body
PF: predicated region fallthrough
CT: control target
= control target key end

     0   :  { %s615_s15 = smov 0   ;;  %s692_s0 = inlined_call_operand.vmem [shape: bf16[8,256], index: 0, kind: input, shape index: {}]   ;;  %s693_s1 = inlined_call_operand.vmem [shape: bf16[3,256,128], index: 1, kind: input, shape index: {}]   ;;  %s694_s2 = inlined_call_operand.vmem [shape: f32[3,128,128], index: 2, kind: input, shape index: {}]   ;;  %s695_s3 = inlined_call_operand.vmem [shape: f32[3,1,128], index: 3, kind: input, shape index: {}]   ;;  %s696_s4 = inlined_call_operand.vmem [shape: f32[8,128], index: 4, kind: output, shape index: {}]  }
   0x1 LB: > { %s478_s16 = sadd.s32 4294967295, %s587_s15   ;;  %p481_p0 = scmp.ge.s32.totalorder %s587_s15, 1  ;;  %s587_s15 = sphi %s615_s15, %s14_s15  }
   0x2   : > { %p175_p1 = scmp.lt.s32.totalorder %s587_s15, 4 }
   0x4   : > { %p176_p2 = pnand %p481_p0, %p175_p1 }
   0x5   : > { %p204_p3 = scmp.lt.s32.totalorder (!%p176_p2), %s478_s16, 2  ;;  %p486_p4 = scmp.ne.s32.totalorder (!%p176_p2), %s478_s16, 0 }
   0x6   : > { %179 = sbr.rel (%p176_p2) target bundleno = 322 (0x142), region = 36 }
   0xb   : > { %s623_s17 = scalar_select %p204_p3, %s478_s16, 2 }
   0xc   : > { %220 = sbr.rel (%p486_p4) target bundleno = 19 (0x13), region = 40 }
   0xd   : > { %s553_s18 = sshll.u32 %s623_s17, 7  ;;  %s216_s21 = scalar_lea.vmem %s695_s3, %s623_s17 }
   0xe   : > { %s633_s24 = scalar_lea.vmem %s693_s1, %s553_s18  ;;  %s638_s27 = scalar_lea.vmem %s694_s2, %s553_s18 }
  0x11   : > { %v589_v0 = vmov 0.0  }
  0x12   : > { %221 = vst [vmem:[%s696_s4] sm:$0xff] %v589_v0 }
  0x13 PF: > { %v562_v1 = vld [vmem:[%s633_s24 + $0x38] sm:$0xff]  ;;  %v561_v3 = vld [vmem:[%s633_s24 + $0x30] sm:$0xff]  ;;  %v560_v5 = vld [vmem:[%s633_s24 + $0x28] sm:$0xff] }
  0x14   : > { %v570_v2 = vld [vmem:[%s633_s24 + $0x78] sm:$0xff]  ;;  %358 = vmatpush.bf16.msra.mxu0 %v562_v1  ;;  %v569_v4 = vld [vmem:[%s633_s24 + $0x70] sm:$0xff]  ;;  %v568_v6 = vld [vmem:[%s633_s24 + $0x68] sm:$0xff] }
  0x15   : > { %371 = vmatpush.bf16.msra.mxu1 %v570_v2  ;;  %v399_v7 = vld [vmem:[%s638_s27 + $0x70] sm:$0xff]  ;;  %v400_v8 = vld [vmem:[%s638_s27 + $0x78] sm:$0xff]  ;;  %v397_v9 = vld [vmem:[%s638_s27 + $0x60] sm:$0xff] }
  0x16   : > { %v398_v10 = vld [vmem:[%s638_s27 + $0x68] sm:$0xff]  ;;  %v408_v11 = vpack.c.bf16 %v400_v8, %v399_v7  ;;  %v559_v12 = vld [vmem:[%s633_s24 + $0x20] sm:$0xff]  ;;  %v395_v15 = vld [vmem:[%s638_s27 + $0x50] sm:$0xff] }
  0x17   : > { %v567_v13 = vld [vmem:[%s633_s24 + $0x60] sm:$0xff]  ;;  %v407_v14 = vpack.c.bf16 %v398_v10, %v397_v9  ;;  %v396_v16 = vld [vmem:[%s638_s27 + $0x58] sm:$0xff]  ;;  %v394_v21 = vld [vmem:[%s638_s27 + $0x48] sm:$0xff] }
  0x18   : > { %359 = vmatpush.bf16.msra.mxu0 %v561_v3  ;;  %413 = vmatpush.bf16.msra.mxu2 %v408_v11  ;;  %v558_v17 = vld [vmem:[%s633_s24 + $0x18] sm:$0xff]  ;;  %v406_v18 = vpack.c.bf16 %v396_v16, %v395_v15  ;;  %v393_v20 = vld [vmem:[%s638_s27 + $0x40] sm:$0xff]  ;;  %v557_v22 = vld [vmem:[%s633_s24 + $0x10] sm:$0xff] }
  0x19   : > { %372 = vmatpush.bf16.msra.mxu1 %v569_v4  ;;  %v566_v19 = vld [vmem:[%s633_s24 + $0x58] sm:$0xff]  ;;  %v405_v23 = vpack.c.bf16 %v394_v21, %v393_v20  ;;  %v565_v24 = vld [vmem:[%s633_s24 + $0x50] sm:$0xff]  ;;  %v556_v27 = vld [vmem:[%s633_s24 + $0x8] sm:$0xff] }
  0x1a   : > { %v391_v25 = vld [vmem:[%s638_s27 + $0x30] sm:$0xff]  ;;  %v392_v26 = vld [vmem:[%s638_s27 + $0x38] sm:$0xff]  ;;  %v564_v28 = vld [vmem:[%s633_s24 + $0x48] sm:$0xff] }
  0x1b   : > { %v404_v29 = vpack.c.bf16 %v392_v26, %v391_v25  ;;  %v222_v30 = vld [vmem:[%s692_s0] sm:$0xff]  ;;  %v390_v32 = vld [vmem:[%s638_s27 + $0x28] sm:$0xff]  ;;  %v387_v38 = vld [vmem:[%s638_s27 + $0x10] sm:$0xff] }
  0x1c   : > { %360 = vmatpush.bf16.msra.mxu0 %v560_v5  ;;  %414 = vmatpush.bf16.msra.mxu2 %v407_v14  ;;  %v389_v31 = vld [vmem:[%s638_s27 + $0x20] sm:$0xff]  ;;  %v256_v33 = vunpack.c.l.b16 %v222_v30  ;;  %v257_v34 = vunpack.c.h.b16 %v222_v30  ;;  %v388_v39 = vld [vmem:[%s638_s27 + $0x18] sm:$0xff]  ;;  %v386_v44 = vld [vmem:[%s638_s27 + $0x8] sm:$0xff] }
  0x1d   : > { %373 = vmatpush.bf16.msra.mxu1 %v568_v6  ;;  %v403_v35 = vpack.c.bf16 %v390_v32, %v389_v31  ;;  %v555_v36 = vld [vmem:[%s633_s24] sm:$0xff]  ;;  %v402_v42 = vpack.c.bf16 %v388_v39, %v387_v38 }
  0x1e   : > { %v563_v37 = vld [vmem:[%s633_s24 + $0x40] sm:$0xff]  ;;  %v258_v40 = vpack.c.b16 %v256_v33, %v256_v33  ;;  %v259_v41 = vpack.c.b16 %v257_v34, %v257_v34 }
  0x1f   : > { %v385_v43 = vld [vmem:[%s638_s27] sm:$0xff] }
  0x20   : > { %361 = vmatpush.bf16.msra.mxu0 %v559_v12  ;;  %415 = vmatpush.bf16.msra.mxu2 %v406_v18  ;;  %v401_v45 = vpack.c.bf16 %v386_v44, %v385_v43  ;;  %v580_v52 = vld [vmem:[%s216_s21] ss:$0 sm:$0xff] }
  0x21   : > { %374 = vmatpush.bf16.msra.mxu1 %v567_v13  ;;  %v426_v54 = vld [vmem:[%s696_s4] sm:$0xff] }
  0x24   : > { %362 = vmatpush.bf16.msra.mxu0 %v558_v17  ;;  %416 = vmatpush.bf16.msra.mxu2 %v405_v23 }
  0x25   : > { %375 = vmatpush.bf16.msra.mxu1 %v566_v19 }
  0x28   : > { %363 = vmatpush.bf16.msra.mxu0 %v557_v22  ;;  %417 = vmatpush.bf16.msra.mxu2 %v404_v29 }
  0x29   : > { %376 = vmatpush.bf16.msra.mxu1 %v565_v24 }
  0x2c   : > { %364 = vmatpush.bf16.msra.mxu0 %v556_v27  ;;  %418 = vmatpush.bf16.msra.mxu2 %v403_v35 }
  0x2d   : > { %377 = vmatpush.bf16.msra.mxu1 %v564_v28 }
  0x30   : > { %365 = vmatpush.bf16.msra.mxu0 %v555_v36  ;;  %419 = vmatpush.bf16.msra.mxu2 %v402_v42 }
  0x31   : > { %378 = vmatpush.bf16.msra.mxu1 %v563_v37 }
  0x33   : > { %366 = vmatmul.bf16.vlgmr.msra.gmra.mxu0 %v258_v40 }
  0x34   : > { %379 = vmatmul.bf16.vlgmr.msra.gmra.mxu1 %v259_v41  ;;  %420 = vmatpush.bf16.msra.mxu2 %v401_v45 }
  0xb0   : > { %v367_v46 = vpop.f32.mrf.mxu0 }
  0xb1   : > { %v380_v47 = vpop.f32.mrf.mxu1 }
  0xb2   : > { %v381_v48 = vadd.f32 %v380_v47, %v367_v46 }
  0xb4   : > { %v384_v49 = vpack.c.bf16 %v381_v48, %v381_v48 }
  0xb6   : > { %421 = vmatmul.bf16.vlgmr.msra.gmra.mxu2 %v384_v49 }
  0xb8   : > { %v369_v50 = vpop.f32.mrf.mxu0 }
  0xb9   : > { %v382_v51 = vpop.f32.mrf.mxu1 }
 0x139   : > { %v422_v53 = vpop.f32.mrf.mxu2 }
 0x13a   : > { %v423_v55 = vadd.f32 %v580_v52, %v422_v53 }
 0x13c   : > { %v427_v56 = vadd.f32 %v426_v54, %v423_v55 }
 0x13e   : > { %428 = vst [vmem:[%s696_s4] sm:$0xff] %v427_v56 }
 0x141   : > { %v424_v57 = vpop.f32.mrf.mxu2 }
 0x142 PF: > { %s14_s15 = sadd.s32 1, %s587_s15  }
 0x143   : > { %p11_p5 = scmp.ge.s32.totalorder %s14_s15, 5  }
 0x145   :  { %13 = sbr.rel (!%p11_p5) target bundleno = 1 (0x1), region = 72 }

// kernel: gin_forward.3
= control target key start
LH: loop header
LB: loop body
LE: loop exit
PB: predicated region body
PF: predicated region fallthrough
CT: control target
= control target key end

     0   :  { %s4092_s2 = inlined_call_operand.vmem [shape: f32[256,128], index: 2, kind: input, shape index: {}]   ;;  %s4093_s1 = inlined_call_operand.vmem [shape: bf16[256,256], index: 1, kind: input, shape index: {}]   ;;  %s4094_s3 = inlined_call_operand.vmem [shape: f32[128,128], index: 3, kind: input, shape index: {}]   ;;  %s4095_s0 = inlined_call_operand.<no memory space> [shape: f32[1], index: 0, kind: input, shape index: {}]   ;;  %s4096_s5 = inlined_call_operand.vmem [shape: f32[1,128], index: 5, kind: input, shape index: {}]   ;;  %s4097_s7 = inlined_call_operand.vmem [shape: f32[1,128], index: 7, kind: input, shape index: {}]   ;;  %s4098_s8 = inlined_call_operand.vmem [shape: f32[1,128], index: 8, kind: input, shape index: {}]   ;;  %s4099_s4 = inlined_call_operand.vmem [shape: f32[128,128], index: 4, kind: input, shape index: {}]   ;;  %s4100_s6 = inlined_call_operand.vmem [shape: f32[1,128], index: 6, kind: input, shape index: {}]   ;;  %s4101_s9 = inlined_call_operand.vmem [shape: f32[1,128], index: 9, kind: input, shape index: {}]   ;;  %s4102_s10 = inlined_call_operand.vmem [shape: f32[1,128], index: 10, kind: input, shape index: {}]   ;;  %s4103_s11 = inlined_call_operand.vmem [shape: f32[1,128], index: 11, kind: input, shape index: {}]   ;;  %s4104_s12 = inlined_call_operand.vmem [shape: f32[1,128], index: 12, kind: input, shape index: {}]   ;;  %s4105_s13 = inlined_call_operand.vmem [shape: f32[256,128], index: 13, kind: output, shape index: {}]  }
   0x1   :  { %v1918_v0 = vld [vmem:[%s4092_s2 + $0x70] sm:$0xff]  ;;  %v1923_v1 = vld [vmem:[%s4092_s2 + $0x78] sm:$0xff]  ;;  %v1940_v5 = vld [vmem:[%s4092_s2 + $0x60] sm:$0xff] }
   0x2   :  { %v1928_v2 = vld [vmem:[%s4092_s2 + $0xf0] sm:$0xff]  ;;  %v116_v3 = vpack.c.bf16 %v1923_v1, %v1918_v0  ;;  %v1935_v4 = vld [vmem:[%s4092_s2 + $0xf8] sm:$0xff]  ;;  %v1945_v6 = vld [vmem:[%s4092_s2 + $0x68] sm:$0xff] }
   0x3   :  { %v124_v7 = vpack.c.bf16 %v1935_v4, %v1928_v2  ;;  %v1952_v8 = vld [vmem:[%s4092_s2 + $0xe0] sm:$0xff]  ;;  %v1957_v9 = vld [vmem:[%s4092_s2 + $0xe8] sm:$0xff]  ;;  %v115_v10 = vpack.c.bf16 %v1945_v6, %v1940_v5  ;;  %v1966_v12 = vld [vmem:[%s4092_s2 + $0x50] sm:$0xff] }
   0x4   :  { %319 = vmatpush.bf16.msra.mxu0 %v116_v3  ;;  %v123_v11 = vpack.c.bf16 %v1957_v9, %v1952_v8  ;;  %v1971_v13 = vld [vmem:[%s4092_s2 + $0x58] sm:$0xff]  ;;  %v1976_v14 = vld [vmem:[%s4092_s2 + $0xd0] sm:$0xff]  ;;  %v1990_v18 = vld [vmem:[%s4092_s2 + $0x40] sm:$0xff] }
   0x5   :  { %408 = vmatpush.bf16.msra.mxu1 %v124_v7  ;;  %v1981_v15 = vld [vmem:[%s4092_s2 + $0xd8] sm:$0xff]  ;;  %v114_v16 = vpack.c.bf16 %v1971_v13, %v1966_v12  ;;  %v1995_v19 = vld [vmem:[%s4092_s2 + $0x48] sm:$0xff]  ;;  %v2000_v20 = vld [vmem:[%s4092_s2 + $0xc0] sm:$0xff] }
   0x6   :  { %v122_v17 = vpack.c.bf16 %v1981_v15, %v1976_v14  ;;  %v2005_v21 = vld [vmem:[%s4092_s2 + $0xc8] sm:$0xff]  ;;  %v113_v22 = vpack.c.bf16 %v1995_v19, %v1990_v18  ;;  %v2014_v24 = vld [vmem:[%s4092_s2 + $0x30] sm:$0xff]  ;;  %v2019_v25 = vld [vmem:[%s4092_s2 + $0x38] sm:$0xff] }
   0x7   :  { %v121_v23 = vpack.c.bf16 %v2005_v21, %v2000_v20  ;;  %v2024_v26 = vld [vmem:[%s4092_s2 + $0xb0] sm:$0xff]  ;;  %v2029_v27 = vld [vmem:[%s4092_s2 + $0xb8] sm:$0xff]  ;;  %v112_v28 = vpack.c.bf16 %v2019_v25, %v2014_v24  ;;  %v2038_v30 = vld [vmem:[%s4092_s2 + $0x20] sm:$0xff] }
   0x8   :  { %320 = vmatpush.bf16.msra.mxu0 %v115_v10  ;;  %v120_v29 = vpack.c.bf16 %v2029_v27, %v2024_v26  ;;  %v2043_v31 = vld [vmem:[%s4092_s2 + $0x28] sm:$0xff]  ;;  %v2048_v32 = vld [vmem:[%s4092_s2 + $0xa0] sm:$0xff]  ;;  %v2062_v36 = vld [vmem:[%s4092_s2 + $0x10] sm:$0xff] }
   0x9   :  { %409 = vmatpush.bf16.msra.mxu1 %v123_v11  ;;  %v2053_v33 = vld [vmem:[%s4092_s2 + $0xa8] sm:$0xff]  ;;  %v111_v34 = vpack.c.bf16 %v2043_v31, %v2038_v30  ;;  %v2067_v37 = vld [vmem:[%s4092_s2 + $0x18] sm:$0xff]  ;;  %v2072_v38 = vld [vmem:[%s4092_s2 + $0x90] sm:$0xff] }
   0xa   :  { %v119_v35 = vpack.c.bf16 %v2053_v33, %v2048_v32  ;;  %v2077_v39 = vld [vmem:[%s4092_s2 + $0x98] sm:$0xff]  ;;  %v110_v40 = vpack.c.bf16 %v2067_v37, %v2062_v36  ;;  %v2086_v42 = vld [vmem:[%s4092_s2] sm:$0xff]  ;;  %v2091_v43 = vld [vmem:[%s4092_s2 + $0x8] sm:$0xff] }
   0xb   :  { %v118_v41 = vpack.c.bf16 %v2077_v39, %v2072_v38  ;;  %v2096_v44 = vld [vmem:[%s4092_s2 + $0x80] sm:$0xff]  ;;  %v2101_v45 = vld [vmem:[%s4092_s2 + $0x88] sm:$0xff]  ;;  %v109_v46 = vpack.c.bf16 %v2091_v43, %v2086_v42  ;;  %v1677_v54 = vld [vmem:[%s4093_s1 + $0x10] sm:$0xf] }
   0xc   :  { %321 = vmatpush.bf16.msra.mxu0 %v114_v16  ;;  %v1669_v47 = vld [vmem:[%s4093_s1] sm:$0xf]  ;;  %v1796_v48 = vld [vmem:[%s4093_s1 + $0x4] sm:$0xf0]  ;;  %v117_v49 = vpack.c.bf16 %v2101_v45, %v2096_v44  ;;  %v1795_v50 = vld [vmem:[%s4093_s1 + $0x4] sm:$0xf] }
   0xd   :  { %410 = vmatpush.bf16.msra.mxu1 %v122_v17  ;;  %v1671_v51 = vld [vmem:[%s4093_s1 + $0x8] sm:$0xf0]  ;;  %v1670_v52 = vor.u32 %v1796_v48, %v1669_v47  ;;  %v1798_v55 = vld [vmem:[%s4093_s1 + $0x14] sm:$0xf0]  ;;  %v1797_v56 = vld [vmem:[%s4093_s1 + $0x14] sm:$0xf] }
   0xe   :  { %v1674_v53 = vor.u32 %v1795_v50, %v1671_v51  ;;  %v1679_v57 = vld [vmem:[%s4093_s1 + $0x18] sm:$0xf0]  ;;  %v1678_v58 = vor.u32 %v1798_v55, %v1677_v54  ;;  %v1685_v60 = vld [vmem:[%s4093_s1 + $0x20] sm:$0xf]  ;;  %v1800_v61 = vld [vmem:[%s4093_s1 + $0x24] sm:$0xf0] }
   0xf   :  { %v1682_v59 = vor.u32 %v1797_v56, %v1679_v57  ;;  %v1799_v62 = vld [vmem:[%s4093_s1 + $0x24] sm:$0xf]  ;;  %v1687_v63 = vld [vmem:[%s4093_s1 + $0x28] sm:$0xf0]  ;;  %v1686_v3 = vor.u32 %v1800_v61, %v1685_v60  ;;  %v1693_v10 = vld [vmem:[%s4093_s1 + $0x30] sm:$0xf] }
  0x10   :  { %322 = vmatpush.bf16.msra.mxu0 %v113_v22  ;;  %v1690_v7 = vor.u32 %v1799_v62, %v1687_v63  ;;  %v1802_v11 = vld [vmem:[%s4093_s1 + $0x34] sm:$0xf0]  ;;  %v1801_v16 = vld [vmem:[%s4093_s1 + $0x34] sm:$0xf]  ;;  %v1695_v17 = vld [vmem:[%s4093_s1 + $0x38] sm:$0xf0] }
  0x11   :  { %411 = vmatpush.bf16.msra.mxu1 %v121_v23  ;;  %v1694_v22 = vor.u32 %v1802_v11, %v1693_v10  ;;  %v1698_v23 = vor.u32 %v1801_v16, %v1695_v17  ;;  %v528_v47 = vld [vmem:[%s4094_s3 + $0x78] sm:$0xff]  ;;  %v1805_v51 = vld [vmem:[%s4093_s1 + $0x54] sm:$0xf]  ;;  %v525_v55 = vld [vmem:[%s4094_s3 + $0x60] sm:$0xff] }
  0x12   :  { %v1806_v50 = vld [vmem:[%s4093_s1 + $0x54] sm:$0xf0]  ;;  %v526_v56 = vld [vmem:[%s4094_s3 + $0x68] sm:$0xff]  ;;  %v521_v61 = vld [vmem:[%s4094_s3 + $0x40] sm:$0xff] }
  0x13   :  { %v535_v57 = vpack.c.bf16 %v526_v56, %v525_v55  ;;  %v522_v62 = vld [vmem:[%s4094_s3 + $0x48] sm:$0xff]  ;;  %v1807_v10 = vld [vmem:[%s4093_s1 + $0x64] sm:$0xf]  ;;  %v519_v16 = vld [vmem:[%s4094_s3 + $0x30] sm:$0xff] }
  0x14   :  { %323 = vmatpush.bf16.msra.mxu0 %v112_v28  ;;  %v1701_v28 = vld [vmem:[%s4093_s1 + $0x40] sm:$0xf]  ;;  %v533_v63 = vpack.c.bf16 %v522_v62, %v521_v61  ;;  %v1719_v11 = vld [vmem:[%s4093_s1 + $0x68] sm:$0xf0]  ;;  %v520_v17 = vld [vmem:[%s4094_s3 + $0x38] sm:$0xff]  ;;  %v2266_v61 = vstv %s4095_s0 }
  0x15   :  { %412 = vmatpush.bf16.msra.mxu1 %v120_v29  ;;  %v1804_v29 = vld [vmem:[%s4093_s1 + $0x44] sm:$0xf0]  ;;  %v1733_v56 = vld [vmem:[%s4093_s1 + $0x80] sm:$0xf] }
  0x18   :  { %324 = vmatpush.bf16.msra.mxu0 %v111_v34  ;;  %v1803_v34 = vld [vmem:[%s4093_s1 + $0x44] sm:$0xf] }
  0x19   :  { %413 = vmatpush.bf16.msra.mxu1 %v119_v35  ;;  %v1703_v35 = vld [vmem:[%s4093_s1 + $0x48] sm:$0xf0] }
  0x1c   :  { %325 = vmatpush.bf16.msra.mxu0 %v110_v40  ;;  %v1702_v40 = vor.u32 %v1804_v29, %v1701_v28  ;;  %v1722_v28 = vor.u32 %v1807_v10, %v1719_v11  ;;  %v517_v29 = vld [vmem:[%s4094_s3 + $0x20] sm:$0xff]  ;;  %v128_v10 = vmul.f32 %v2266_v61, %v2091_v43  ;;  %v1743_v43 = vld [vmem:[%s4093_s1 + $0x98] sm:$0xf0] }
  0x1d   :  { %414 = vmatpush.bf16.msra.mxu1 %v118_v41  ;;  %v1706_v41 = vor.u32 %v1803_v34, %v1703_v35  ;;  %v518_v34 = vld [vmem:[%s4094_s3 + $0x28] sm:$0xff] }
  0x1e   :  { %v531_v35 = vpack.c.bf16 %v518_v34, %v517_v29  ;;  %v1741_v29 = vld [vmem:[%s4093_s1 + $0x90] sm:$0xf]  ;;  %v1814_v34 = vld [vmem:[%s4093_s1 + $0x94] sm:$0xf0] }
  0x20   :  { %326 = vmatpush.bf16.msra.mxu0 %v109_v46  ;;  %v527_v46 = vld [vmem:[%s4094_s3 + $0x70] sm:$0xff] }
  0x21   :  { %415 = vmatpush.bf16.msra.mxu1 %v117_v49  ;;  %v536_v48 = vpack.c.bf16 %v528_v47, %v527_v46  ;;  %v1709_v49 = vld [vmem:[%s4093_s1 + $0x50] sm:$0xf]  ;;  %v513_v47 = vld [vmem:[%s4094_s3] sm:$0xff] }
  0x23   :  { %327 = vmatmul.bf16.vlgmr.msra.gmra.mxu0 %v1670_v52  ;;  %541 = vmatpush.bf16.msra.mxu2 %v536_v48  ;;  %v1711_v52 = vld [vmem:[%s4093_s1 + $0x58] sm:$0xf0]  ;;  %v514_v48 = vld [vmem:[%s4094_s3 + $0x8] sm:$0xff] }
  0x24   :  { %416 = vmatmul.bf16.vlgmr.msra.gmra.mxu1 %v1674_v53  ;;  %v1710_v53 = vor.u32 %v1806_v50, %v1709_v49  ;;  %v1714_v54 = vor.u32 %v1805_v51, %v1711_v52  ;;  %v529_v49 = vpack.c.bf16 %v514_v48, %v513_v47  ;;  %v1725_v50 = vld [vmem:[%s4093_s1 + $0x70] sm:$0xf]  ;;  %v1810_v51 = vld [vmem:[%s4093_s1 + $0x74] sm:$0xf0]  ;;  %v1809_v52 = vld [vmem:[%s4093_s1 + $0x74] sm:$0xf]  ;;  %v129_v48 = vmul.f32 %v2266_v61, %v2062_v36 }
  0x27   :  { %542 = vmatpush.bf16.msra.mxu2 %v535_v57  ;;  %v1812_v57 = vld [vmem:[%s4093_s1 + $0x84] sm:$0xf0] }
  0x33   :  { %332 = vmatmul.bf16.gmra.mxu0 %v1678_v58  ;;  %v523_v58 = vld [vmem:[%s4094_s3 + $0x50] sm:$0xff] }
  0x34   :  { %421 = vmatmul.bf16.gmra.mxu1 %v1682_v59  ;;  %v524_v59 = vld [vmem:[%s4094_s3 + $0x58] sm:$0xff] }
  0x35   :  { %v534_v60 = vpack.c.bf16 %v524_v59, %v523_v58  ;;  %v1811_v58 = vld [vmem:[%s4093_s1 + $0x84] sm:$0xf]  ;;  %v1735_v59 = vld [vmem:[%s4093_s1 + $0x88] sm:$0xf0] }
  0x37   :  { %543 = vmatpush.bf16.msra.mxu2 %v534_v60  ;;  %v1734_v60 = vor.u32 %v1812_v57, %v1733_v56  ;;  %v1749_v56 = vld [vmem:[%s4093_s1 + $0xa0] sm:$0xf]  ;;  %v1816_v57 = vld [vmem:[%s4093_s1 + $0xa4] sm:$0xf0] }
  0x3b   :  { %544 = vmatpush.bf16.msra.mxu2 %v533_v63  ;;  %v1738_v63 = vor.u32 %v1811_v58, %v1735_v59  ;;  %v1815_v58 = vld [vmem:[%s4093_s1 + $0xa4] sm:$0xf]  ;;  %v1750_v59 = vor.u32 %v1816_v57, %v1749_v56 }
  0x43   :  { %337 = vmatmul.bf16.gmra.mxu0 %v1686_v3  ;;  %v1717_v3 = vld [vmem:[%s4093_s1 + $0x60] sm:$0xf] }
  0x44   :  { %426 = vmatmul.bf16.gmra.mxu1 %v1690_v7  ;;  %v1808_v7 = vld [vmem:[%s4093_s1 + $0x64] sm:$0xf0] }
  0x53   :  { %342 = vmatmul.bf16.gmra.mxu0 %v1694_v22  ;;  %v1718_v22 = vor.u32 %v1808_v7, %v1717_v3  ;;  %v127_v7 = vmul.f32 %v2266_v61, %v2086_v42 }
  0x54   :  { %431 = vmatmul.bf16.gmra.mxu1 %v1698_v23  ;;  %v532_v23 = vpack.c.bf16 %v520_v17, %v519_v16 }
  0x56   :  { %545 = vmatpush.bf16.msra.mxu2 %v532_v23 }
  0x5a   :  { %546 = vmatpush.bf16.msra.mxu2 %v531_v35  ;;  %v1813_v35 = vld [vmem:[%s4093_s1 + $0x94] sm:$0xf] }
  0x63   :  { %347 = vmatmul.bf16.gmra.mxu0 %v1702_v40  ;;  %v515_v40 = vld [vmem:[%s4094_s3 + $0x10] sm:$0xff] }
  0x64   :  { %436 = vmatmul.bf16.gmra.mxu1 %v1706_v41  ;;  %v516_v41 = vld [vmem:[%s4094_s3 + $0x18] sm:$0xff] }
  0x65   :  { %v530_v46 = vpack.c.bf16 %v516_v41, %v515_v40  ;;  %v1742_v40 = vor.u32 %v1814_v34, %v1741_v29  ;;  %v1818_v29 = vld [vmem:[%s4093_s1 + $0xb4] sm:$0xf0]  ;;  %v1817_v34 = vld [vmem:[%s4093_s1 + $0xb4] sm:$0xf] }
  0x67   :  { %547 = vmatpush.bf16.msra.mxu2 %v530_v46  ;;  %v1746_v46 = vor.u32 %v1813_v35, %v1743_v43 }
  0x6b   :  { %548 = vmatpush.bf16.msra.mxu2 %v529_v49  ;;  %v130_v49 = vmul.f32 %v2266_v61, %v2067_v37  ;;  %v1751_v37 = vld [vmem:[%s4093_s1 + $0xa8] sm:$0xf0] }
  0x73   :  { %352 = vmatmul.bf16.gmra.mxu0 %v1710_v53  ;;  %v1727_v53 = vld [vmem:[%s4093_s1 + $0x78] sm:$0xf0] }
  0x74   :  { %441 = vmatmul.bf16.gmra.mxu1 %v1714_v54  ;;  %v1726_v54 = vor.u32 %v1810_v51, %v1725_v50  ;;  %v1730_v55 = vor.u32 %v1809_v52, %v1727_v53 }
  0x83   :  { %357 = vmatmul.bf16.gmra.mxu0 %v1718_v22 }
  0x84   :  { %446 = vmatmul.bf16.gmra.mxu1 %v1722_v28 }
  0x93   :  { %362 = vmatmul.bf16.gmra.mxu0 %v1726_v54 }
  0x94   :  { %451 = vmatmul.bf16.gmra.mxu1 %v1730_v55 }
  0xa0   :  { %v328_v62 = vpop.f32.mrf.mxu0 }
  0xa1   :  { %v417_v3 = vpop.f32.mrf.mxu1  ;;  %v329_v11 = vadd.f32 %v328_v62, %v127_v7  ;;  %v1754_v62 = vor.u32 %v1815_v58, %v1751_v37  ;;  %v132_v7 = vmul.f32 %v2266_v61, %v2043_v31  ;;  %v1759_v31 = vld [vmem:[%s4093_s1 + $0xb8] sm:$0xf0]  ;;  %v135_v37 = vmul.f32 %v2266_v61, %v1990_v18 }
  0xa2   :  { %v1762_v43 = vor.u32 %v1817_v34, %v1759_v31  ;;  %v138_v34 = vmul.f32 %v2266_v61, %v1971_v13  ;;  %v1783_v13 = vld [vmem:[%s4093_s1 + $0xe8] sm:$0xf0] }
  0xa3   :  { %367 = vmatmul.bf16.gmra.mxu0 %v1734_v60  ;;  %v418_v23 = vadd.f32 %v417_v3, %v329_v11  ;;  %v131_v3 = vmul.f32 %v2266_v61, %v2038_v30 }
  0xa4   :  { %456 = vmatmul.bf16.gmra.mxu1 %v1738_v63 }
  0xa8   :  { %v330_v16 = vpop.f32.mrf.mxu0 }
  0xa9   :  { %v331_v17 = vadd.f32 %v330_v16, %v128_v10  ;;  %v419_v22 = vpop.f32.mrf.mxu1 }
  0xab   :  { %v420_v28 = vadd.f32 %v419_v22, %v331_v17 }
  0xad   :  { %v497_v42 = vpack.c.bf16 %v420_v28, %v418_v23  ;;  %v1757_v28 = vld [vmem:[%s4093_s1 + $0xb0] sm:$0xf] }
  0xaf   :  { %549 = vmatmul.bf16.vlgmr.msra.gmra.mxu2 %v497_v42  ;;  %v1758_v42 = vor.u32 %v1818_v29, %v1757_v28 }
  0xb0   :  { %v333_v41 = vpop.f32.mrf.mxu0 }
  0xb1   :  { %v422_v47 = vpop.f32.mrf.mxu1  ;;  %v334_v50 = vadd.f32 %v333_v41, %v129_v48  ;;  %v133_v41 = vmul.f32 %v2266_v61, %v2014_v24 }
  0xb3   :  { %372 = vmatmul.bf16.gmra.mxu0 %v1742_v40  ;;  %v423_v54 = vadd.f32 %v422_v47, %v334_v50 }
  0xb4   :  { %461 = vmatmul.bf16.gmra.mxu1 %v1746_v46  ;;  %v134_v46 = vmul.f32 %v2266_v61, %v2019_v25  ;;  %v1767_v25 = vld [vmem:[%s4093_s1 + $0xc8] sm:$0xf0] }
  0xb8   :  { %v335_v51 = vpop.f32.mrf.mxu0 }
  0xb9   :  { %v336_v52 = vadd.f32 %v335_v51, %v130_v49  ;;  %v424_v53 = vpop.f32.mrf.mxu1 }
  0xbb   :  { %v425_v55 = vadd.f32 %v424_v53, %v336_v52  ;;  %v1765_v53 = vld [vmem:[%s4093_s1 + $0xc0] sm:$0xf] }
  0xbd   :  { %v498_v36 = vpack.c.bf16 %v425_v55, %v423_v54  ;;  %v1820_v54 = vld [vmem:[%s4093_s1 + $0xc4] sm:$0xf0]  ;;  %v1819_v55 = vld [vmem:[%s4093_s1 + $0xc4] sm:$0xf] }
  0xbe   :  { %v1766_v56 = vor.u32 %v1820_v54, %v1765_v53  ;;  %v139_v53 = vmul.f32 %v2266_v61, %v1940_v5  ;;  %v140_v54 = vmul.f32 %v2266_v61, %v1945_v6  ;;  %v1791_v6 = vld [vmem:[%s4093_s1 + $0xf8] sm:$0xf0] }
  0xbf   :  { %554 = vmatmul.bf16.gmra.mxu2 %v498_v36  ;;  %v1770_v36 = vor.u32 %v1819_v55, %v1767_v25 }
  0xc0   :  { %v338_v60 = vpop.f32.mrf.mxu0 }
  0xc1   :  { %v427_v63 = vpop.f32.mrf.mxu1  ;;  %v339_v10 = vadd.f32 %v338_v60, %v131_v3 }
  0xc3   :  { %377 = vmatmul.bf16.gmra.mxu0 %v1750_v59  ;;  %v428_v22 = vadd.f32 %v427_v63, %v339_v10  ;;  %v136_v59 = vmul.f32 %v2266_v61, %v1995_v19  ;;  %v1775_v19 = vld [vmem:[%s4093_s1 + $0xd8] sm:$0xf0] }
  0xc4   :  { %466 = vmatmul.bf16.gmra.mxu1 %v1754_v62 }
  0xc8   :  { %v340_v11 = vpop.f32.mrf.mxu0 }
  0xc9   :  { %v341_v16 = vadd.f32 %v340_v11, %v132_v7  ;;  %v429_v17 = vpop.f32.mrf.mxu1  ;;  %v1773_v11 = vld [vmem:[%s4093_s1 + $0xd0] sm:$0xf] }
  0xcb   :  { %v430_v23 = vadd.f32 %v429_v17, %v341_v16  ;;  %v1822_v16 = vld [vmem:[%s4093_s1 + $0xd4] sm:$0xf0]  ;;  %v1821_v17 = vld [vmem:[%s4093_s1 + $0xd4] sm:$0xf] }
  0xcc   :  { %v1778_v28 = vor.u32 %v1821_v17, %v1775_v19 }
  0xcd   :  { %v499_v30 = vpack.c.bf16 %v430_v23, %v428_v22  ;;  %v1774_v22 = vor.u32 %v1822_v16, %v1773_v11 }
  0xcf   :  { %559 = vmatmul.bf16.gmra.mxu2 %v499_v30  ;;  %v137_v30 = vmul.f32 %v2266_v61, %v1966_v12 }
  0xd0   :  { %v343_v35 = vpop.f32.mrf.mxu0 }
  0xd1   :  { %v432_v40 = vpop.f32.mrf.mxu1  ;;  %v344_v47 = vadd.f32 %v343_v35, %v133_v41 }
  0xd3   :  { %382 = vmatmul.bf16.gmra.mxu0 %v1758_v42  ;;  %v433_v51 = vadd.f32 %v432_v40, %v344_v47  ;;  %v1824_v47 = vld [vmem:[%s4093_s1 + $0xe4] sm:$0xf0] }
  0xd4   :  { %471 = vmatmul.bf16.gmra.mxu1 %v1762_v43 }
  0xd8   :  { %v345_v48 = vpop.f32.mrf.mxu0 }
  0xd9   :  { %v346_v49 = vadd.f32 %v345_v48, %v134_v46  ;;  %v434_v50 = vpop.f32.mrf.mxu1  ;;  %v1781_v46 = vld [vmem:[%s4093_s1 + $0xe0] sm:$0xf]  ;;  %v1823_v48 = vld [vmem:[%s4093_s1 + $0xe4] sm:$0xf] }
  0xdb   :  { %v435_v52 = vadd.f32 %v434_v50, %v346_v49  ;;  %v1782_v49 = vor.u32 %v1824_v47, %v1781_v46 }
  0xdd   :  { %v500_v24 = vpack.c.bf16 %v435_v52, %v433_v51  ;;  %v1786_v51 = vor.u32 %v1823_v48, %v1783_v13 }
  0xdf   :  { %564 = vmatmul.bf16.gmra.mxu2 %v500_v24 }
  0xe0   :  { %v348_v57 = vpop.f32.mrf.mxu0 }
  0xe1   :  { %v437_v58 = vpop.f32.mrf.mxu1  ;;  %v349_v60 = vadd.f32 %v348_v57, %v135_v37  ;;  %v1826_v37 = vld [vmem:[%s4093_s1 + $0xf4] sm:$0xf0] }
  0xe3   :  { %387 = vmatmul.bf16.gmra.mxu0 %v1766_v56  ;;  %v438_v7 = vadd.f32 %v437_v58, %v349_v60  ;;  %v1789_v58 = vld [vmem:[%s4093_s1 + $0xf0] sm:$0xf] }
  0xe4   :  { %476 = vmatmul.bf16.gmra.mxu1 %v1770_v36  ;;  %v1790_v60 = vor.u32 %v1826_v37, %v1789_v58 }
  0xe8   :  { %v350_v62 = vpop.f32.mrf.mxu0 }
  0xe9   :  { %v351_v63 = vadd.f32 %v350_v62, %v136_v59  ;;  %v439_v3 = vpop.f32.mrf.mxu1  ;;  %v1825_v59 = vld [vmem:[%s4093_s1 + $0xf4] sm:$0xf] }
  0xeb   :  { %v440_v10 = vadd.f32 %v439_v3, %v351_v63  ;;  %v1794_v63 = vor.u32 %v1825_v59, %v1791_v6 }
  0xed   :  { %v501_v18 = vpack.c.bf16 %v440_v10, %v438_v7  ;;  %v141_v7 = vmul.f32 %v2266_v61, %v1918_v0  ;;  %v142_v10 = vmul.f32 %v2266_v61, %v1923_v1  ;;  %v144_v0 = vmul.f32 %v2266_v61, %v2101_v45 }
  0xef   :  { %569 = vmatmul.bf16.gmra.mxu2 %v501_v18 }
  0xf0   :  { %v353_v23 = vpop.f32.mrf.mxu0 }
  0xf1   :  { %v442_v29 = vpop.f32.mrf.mxu1  ;;  %v354_v31 = vadd.f32 %v353_v23, %v137_v30  ;;  %v143_v30 = vmul.f32 %v2266_v61, %v2096_v44  ;;  %v146_v44 = vmul.f32 %v2266_v61, %v2077_v39  ;;  %v148_v39 = vmul.f32 %v2266_v61, %v2053_v33 }
  0xf2   :  { %v150_v33 = vmul.f32 %v2266_v61, %v2029_v27  ;;  %v152_v27 = vmul.f32 %v2266_v61, %v2005_v21  ;;  %v154_v21 = vmul.f32 %v2266_v61, %v1981_v15 }
  0xf3   :  { %392 = vmatmul.bf16.gmra.mxu0 %v1774_v22  ;;  %v443_v40 = vadd.f32 %v442_v29, %v354_v31 }
  0xf4   :  { %481 = vmatmul.bf16.gmra.mxu1 %v1778_v28 }
  0xf8   :  { %v355_v42 = vpop.f32.mrf.mxu0 }
  0xf9   :  { %v356_v35 = vadd.f32 %v355_v42, %v138_v34  ;;  %v444_v43 = vpop.f32.mrf.mxu1 }
  0xfb   :  { %v445_v41 = vadd.f32 %v444_v43, %v356_v35 }
  0xfd   :  { %v502_v12 = vpack.c.bf16 %v445_v41, %v443_v40 }
  0xff   :  { %574 = vmatmul.bf16.gmra.mxu2 %v502_v12  ;;  %v145_v12 = vmul.f32 %v2266_v61, %v2072_v38  ;;  %v147_v38 = vmul.f32 %v2266_v61, %v2048_v32  ;;  %v149_v32 = vmul.f32 %v2266_v61, %v2024_v26  ;;  %v151_v26 = vmul.f32 %v2266_v61, %v2000_v20 }
 0x100   :  { %v358_v50 = vpop.f32.mrf.mxu0  ;;  %v153_v20 = vmul.f32 %v2266_v61, %v1976_v14  ;;  %v156_v14 = vmul.f32 %v2266_v61, %v1957_v9 }
 0x101   :  { %v447_v52 = vpop.f32.mrf.mxu1  ;;  %v359_v24 = vadd.f32 %v358_v50, %v139_v53 }
 0x103   :  { %397 = vmatmul.bf16.gmra.mxu0 %v1782_v49  ;;  %v448_v57 = vadd.f32 %v447_v52, %v359_v24 }
 0x104   :  { %486 = vmatmul.bf16.gmra.mxu1 %v1786_v51 }
 0x108   :  { %v360_v55 = vpop.f32.mrf.mxu0 }
 0x109   :  { %v361_v25 = vadd.f32 %v360_v55, %v140_v54  ;;  %v449_v56 = vpop.f32.mrf.mxu1 }
 0x10b   :  { %v450_v36 = vadd.f32 %v449_v56, %v361_v25 }
 0x10d   :  { %v503_v5 = vpack.c.bf16 %v450_v36, %v448_v57 }
 0x10f   :  { %579 = vmatmul.bf16.gmra.mxu2 %v503_v5 }
 0x110   :  { %v363_v62 = vpop.f32.mrf.mxu0 }
 0x111   :  { %v452_v3 = vpop.f32.mrf.mxu1  ;;  %v364_v11 = vadd.f32 %v363_v62, %v141_v7 }
 0x113   :  { %402 = vmatmul.bf16.gmra.mxu0 %v1790_v60  ;;  %v453_v19 = vadd.f32 %v452_v3, %v364_v11 }
 0x114   :  { %491 = vmatmul.bf16.gmra.mxu1 %v1794_v63 }
 0x118   :  { %v365_v16 = vpop.f32.mrf.mxu0 }
 0x119   :  { %v366_v18 = vadd.f32 %v365_v16, %v142_v10  ;;  %v454_v17 = vpop.f32.mrf.mxu1 }
 0x11b   :  { %v455_v22 = vadd.f32 %v454_v17, %v366_v18 }
 0x11d   :  { %v504_v23 = vpack.c.bf16 %v455_v22, %v453_v19 }
 0x11f   :  { %584 = vmatmul.bf16.gmra.mxu2 %v504_v23 }
 0x120   :  { %v368_v28 = vpop.f32.mrf.mxu0 }
 0x121   :  { %v457_v29 = vpop.f32.mrf.mxu1  ;;  %v369_v34 = vadd.f32 %v368_v28, %v143_v30 }
 0x123   :  { %v458_v35 = vadd.f32 %v457_v29, %v369_v34 }
 0x128   :  { %v370_v31 = vpop.f32.mrf.mxu0 }
 0x129   :  { %v371_v42 = vadd.f32 %v370_v31, %v144_v0  ;;  %v459_v1 = vpop.f32.mrf.mxu1 }
 0x12b   :  { %v460_v43 = vadd.f32 %v459_v1, %v371_v42 }
 0x12d   :  { %v505_v40 = vpack.c.bf16 %v460_v43, %v458_v35 }
 0x12f   :  { %589 = vmatmul.bf16.gmra.mxu2 %v505_v40 }
 0x130   :  { %v373_v41 = vpop.f32.mrf.mxu0 }
 0x131   :  { %v462_v46 = vpop.f32.mrf.mxu1  ;;  %v374_v48 = vadd.f32 %v373_v41, %v145_v12 }
 0x132   :  { %v2388_v47 = vpop.f32.mrf.mxu2 }
 0x133   :  { %v463_v51 = vadd.f32 %v462_v46, %v374_v48 }
 0x138   :  { %v375_v45 = vpop.f32.mrf.mxu0 }
 0x139   :  { %v376_v13 = vadd.f32 %v375_v45, %v146_v44  ;;  %v464_v49 = vpop.f32.mrf.mxu1 }
 0x13a   :  { %v2394_v50 = vpop.f32.mrf.mxu2 }
 0x13b   :  { %v465_v52 = vadd.f32 %v464_v49, %v376_v13 }
 0x13d   :  { %v506_v53 = vpack.c.bf16 %v465_v52, %v463_v51 }
 0x13f   :  { %594 = vmatmul.bf16.gmra.mxu2 %v506_v53 }
 0x140   :  { %v378_v54 = vpop.f32.mrf.mxu0 }
 0x141   :  { %v467_v24 = vpop.f32.mrf.mxu1  ;;  %v379_v25 = vadd.f32 %v378_v54, %v147_v38  ;;  %v155_v54 = vmul.f32 %v2266_v61, %v1952_v8  ;;  %v158_v8 = vmul.f32 %v2266_v61, %v1935_v4  ;;  %v2437_v4 = vld [vmem:[%s4096_s5] ss:$0 sm:$0xff] }
 0x142   :  { %v2396_v55 = vpop.f32.mrf.mxu2 }
 0x143   :  { %v468_v37 = vadd.f32 %v467_v24, %v379_v25 }
 0x148   :  { %v380_v56 = vpop.f32.mrf.mxu0 }
 0x149   :  { %v381_v57 = vadd.f32 %v380_v56, %v148_v39  ;;  %v469_v36 = vpop.f32.mrf.mxu1 }
 0x14a   :  { %v2402_v58 = vpop.f32.mrf.mxu2 }
 0x14b   :  { %v470_v5 = vadd.f32 %v469_v36, %v381_v57 }
 0x14d   :  { %v507_v59 = vpack.c.bf16 %v470_v5, %v468_v37 }
 0x14f   :  { %599 = vmatmul.bf16.gmra.mxu2 %v507_v59 }
 0x150   :  { %v383_v6 = vpop.f32.mrf.mxu0 }
 0x151   :  { %v472_v60 = vpop.f32.mrf.mxu1  ;;  %v384_v63 = vadd.f32 %v383_v6, %v149_v32  ;;  %v157_v6 = vmul.f32 %v2266_v61, %v1928_v2  ;;  %v2441_v61 = vadd.f32 %v2437_v4, %v2394_v50 }
 0x152   :  { %v2404_v62 = vpop.f32.mrf.mxu2 }
 0x153   :  { %v473_v16 = vadd.f32 %v472_v60, %v384_v63  ;;  %v2460_v50 = vadd.f32 %v2437_v4, %v2404_v62 }
 0x158   :  { %v385_v3 = vpop.f32.mrf.mxu0 }
 0x159   :  { %v386_v7 = vadd.f32 %v385_v3, %v150_v33  ;;  %v474_v10 = vpop.f32.mrf.mxu1 }
 0x15a   :  { %v2410_v11 = vpop.f32.mrf.mxu2 }
 0x15b   :  { %v475_v18 = vadd.f32 %v474_v10, %v386_v7 }
 0x15d   :  { %v508_v17 = vpack.c.bf16 %v475_v18, %v473_v16 }
 0x15f   :  { %604 = vmatmul.bf16.gmra.mxu2 %v508_v17 }
 0x160   :  { %v388_v19 = vpop.f32.mrf.mxu0 }
 0x161   :  { %v477_v22 = vpop.f32.mrf.mxu1  ;;  %v389_v28 = vadd.f32 %v388_v19, %v151_v26 }
 0x162   :  { %v2412_v23 = vpop.f32.mrf.mxu2 }
 0x163   :  { %v478_v31 = vadd.f32 %v477_v22, %v389_v28 }
 0x168   :  { %v390_v29 = vpop.f32.mrf.mxu0 }
 0x169   :  { %v391_v30 = vadd.f32 %v390_v29, %v152_v27  ;;  %v479_v0 = vpop.f32.mrf.mxu1 }
 0x16a   :  { %v2418_v34 = vpop.f32.mrf.mxu2 }
 0x16b   :  { %v480_v42 = vadd.f32 %v479_v0, %v391_v30  ;;  %v2445_v30 = vadd.f32 %v2437_v4, %v2388_v47  ;;  %v2449_v0 = vadd.f32 %v2437_v4, %v2396_v55  ;;  %v2465_v55 = vadd.f32 %v2437_v4, %v2410_v11 }
 0x16d   :  { %v509_v1 = vpack.c.bf16 %v480_v42, %v478_v31  ;;  %v632_v31 = vadd.f32 %v2441_v61, %v2445_v30  ;;  %v2455_v42 = vadd.f32 %v2437_v4, %v2402_v58 }
 0x16f   :  { %609 = vmatmul.bf16.gmra.mxu2 %v509_v1 }
 0x170   :  { %v393_v35 = vpop.f32.mrf.mxu0 }
 0x171   :  { %v482_v43 = vpop.f32.mrf.mxu1  ;;  %v394_v41 = vadd.f32 %v393_v35, %v153_v20  ;;  %v633_v35 = vadd.f32 %v632_v31, %v2449_v0  ;;  %v2470_v20 = vadd.f32 %v2437_v4, %v2412_v23 }
 0x172   :  { %v2420_v40 = vpop.f32.mrf.mxu2 }
 0x173   :  { %v483_v45 = vadd.f32 %v482_v43, %v394_v41  ;;  %v634_v47 = vadd.f32 %v633_v35, %v2455_v42 }
 0x175   :  { %v635_v43 = vadd.f32 %v634_v47, %v2460_v50 }
 0x177   :  { %v636_v58 = vadd.f32 %v635_v43, %v2465_v55 }
 0x178   :  { %v395_v46 = vpop.f32.mrf.mxu0 }
 0x179   :  { %v396_v12 = vadd.f32 %v395_v46, %v154_v21  ;;  %v484_v44 = vpop.f32.mrf.mxu1  ;;  %v2475_v21 = vadd.f32 %v2437_v4, %v2418_v34  ;;  %v637_v41 = vadd.f32 %v636_v58, %v2470_v20  ;;  %v2480_v46 = vadd.f32 %v2437_v4, %v2420_v40 }
 0x17a   :  { %v572_v48 = vpop.f32.mrf.mxu2 }
 0x17b   :  { %v485_v13 = vadd.f32 %v484_v44, %v396_v12  ;;  %v638_v11 = vadd.f32 %v637_v41, %v2475_v21  ;;  %v2484_v12 = vadd.f32 %v2437_v4, %v572_v48 }
 0x17d   :  { %v510_v49 = vpack.c.bf16 %v485_v13, %v483_v45  ;;  %v639_v23 = vadd.f32 %v638_v11, %v2480_v46 }
 0x17f   :  { %614 = vmatmul.bf16.gmra.mxu2 %v510_v49  ;;  %v640_v34 = vadd.f32 %v639_v23, %v2484_v12 }
 0x180   :  { %v398_v51 = vpop.f32.mrf.mxu0 }
 0x181   :  { %v487_v52 = vpop.f32.mrf.mxu1  ;;  %v399_v24 = vadd.f32 %v398_v51, %v155_v54 }
 0x182   :  { %v575_v53 = vpop.f32.mrf.mxu2 }
 0x183   :  { %v488_v56 = vadd.f32 %v487_v52, %v399_v24  ;;  %v2488_v44 = vadd.f32 %v2437_v4, %v575_v53 }
 0x185   :  { %v641_v49 = vadd.f32 %v640_v34, %v2488_v44 }
 0x188   :  { %v400_v15 = vpop.f32.mrf.mxu0 }
 0x189   :  { %v401_v38 = vadd.f32 %v400_v15, %v156_v14  ;;  %v489_v39 = vpop.f32.mrf.mxu1 }
 0x18a   :  { %v577_v25 = vpop.f32.mrf.mxu2 }
 0x18b   :  { %v490_v57 = vadd.f32 %v489_v39, %v401_v38  ;;  %v2492_v45 = vadd.f32 %v2437_v4, %v577_v25 }
 0x18d   :  { %v511_v36 = vpack.c.bf16 %v490_v57, %v488_v56  ;;  %v642_v51 = vadd.f32 %v641_v49, %v2492_v45 }
 0x18f   :  { %619 = vmatmul.bf16.gmra.mxu2 %v511_v36 }
 0x190   :  { %v403_v37 = vpop.f32.mrf.mxu0 }
 0x191   :  { %v492_v5 = vpop.f32.mrf.mxu1  ;;  %v404_v60 = vadd.f32 %v403_v37, %v157_v6 }
 0x192   :  { %v580_v59 = vpop.f32.mrf.mxu2 }
 0x193   :  { %v493_v3 = vadd.f32 %v492_v5, %v404_v60  ;;  %v2496_v40 = vadd.f32 %v2437_v4, %v580_v59 }
 0x195   :  { %v643_v52 = vadd.f32 %v642_v51, %v2496_v40 }
 0x198   :  { %v405_v9 = vpop.f32.mrf.mxu0 }
 0x199   :  { %v406_v32 = vadd.f32 %v405_v9, %v158_v8  ;;  %v494_v33 = vpop.f32.mrf.mxu1 }
 0x19a   :  { %v582_v63 = vpop.f32.mrf.mxu2 }
 0x19b   :  { %v495_v7 = vadd.f32 %v494_v33, %v406_v32  ;;  %v2500_v48 = vadd.f32 %v2437_v4, %v582_v63 }
 0x19d   :  { %v512_v10 = vpack.c.bf16 %v495_v7, %v493_v3  ;;  %v644_v54 = vadd.f32 %v643_v52, %v2500_v48 }
 0x19f   :  { %624 = vmatmul.bf16.gmra.mxu2 %v512_v10 }
 0x1a2   :  { %v585_v16 = vpop.f32.mrf.mxu2 }
 0x1a3   :  { %v2504_v53 = vadd.f32 %v2437_v4, %v585_v16 }
 0x1a5   :  { %v645_v15 = vadd.f32 %v644_v54, %v2504_v53 }
 0x1aa   :  { %v587_v18 = vpop.f32.mrf.mxu2 }
 0x1ab   :  { %v2508_v14 = vadd.f32 %v2437_v4, %v587_v18 }
 0x1ad   :  { %v646_v39 = vadd.f32 %v645_v15, %v2508_v14 }
 0x1b2   :  { %v590_v17 = vpop.f32.mrf.mxu2 }
 0x1b3   :  { %v2512_v38 = vadd.f32 %v2437_v4, %v590_v17 }
 0x1b5   :  { %v647_v56 = vadd.f32 %v646_v39, %v2512_v38 }
 0x1ba   :  { %v592_v19 = vpop.f32.mrf.mxu2 }
 0x1bb   :  { %v2516_v25 = vadd.f32 %v2437_v4, %v592_v19 }
 0x1bd   :  { %v648_v36 = vadd.f32 %v647_v56, %v2516_v25 }
 0x1c2   :  { %v595_v22 = vpop.f32.mrf.mxu2 }
 0x1c3   :  { %v2520_v57 = vadd.f32 %v2437_v4, %v595_v22 }
 0x1c5   :  { %v649_v59 = vadd.f32 %v648_v36, %v2520_v57 }
 0x1ca   :  { %v597_v26 = vpop.f32.mrf.mxu2 }
 0x1cb   :  { %v2524_v37 = vadd.f32 %v2437_v4, %v597_v26 }
 0x1cd   :  { %v650_v8 = vadd.f32 %v649_v59, %v2524_v37 }
 0x1d2   :  { %v600_v27 = vpop.f32.mrf.mxu2 }
 0x1d3   :  { %v2528_v6 = vadd.f32 %v2437_v4, %v600_v27 }
 0x1d5   :  { %v651_v9 = vadd.f32 %v650_v8, %v2528_v6 }
 0x1da   :  { %v602_v2 = vpop.f32.mrf.mxu2 }
 0x1db   :  { %v2532_v60 = vadd.f32 %v2437_v4, %v602_v2 }
 0x1dd   :  { %v652_v33 = vadd.f32 %v651_v9, %v2532_v60 }
 0x1e2   :  { %v605_v28 = vpop.f32.mrf.mxu2 }
 0x1e3   :  { %v2536_v32 = vadd.f32 %v2437_v4, %v605_v28 }
 0x1e5   :  { %v653_v7 = vadd.f32 %v652_v33, %v2536_v32 }
 0x1ea   :  { %v607_v29 = vpop.f32.mrf.mxu2 }
 0x1eb   :  { %v2540_v63 = vadd.f32 %v2437_v4, %v607_v29 }
 0x1ed   :  { %v654_v16 = vadd.f32 %v653_v7, %v2540_v63 }
 0x1f2   :  { %v610_v1 = vpop.f32.mrf.mxu2 }
 0x1f3   :  { %v2544_v10 = vadd.f32 %v2437_v4, %v610_v1  ;;  %v1844_v1 = vmov 256.0  }
 0x1f4   :  { %1836 = vrcp.f32 %v1844_v1 }
 0x1f5   :  { %v655_v17 = vadd.f32 %v654_v16, %v2544_v10 }
 0x1fa   :  { %v612_v62 = vpop.f32.mrf.mxu2 }
 0x1fb   :  { %v2548_v18 = vadd.f32 %v2437_v4, %v612_v62  ;;  %v1837_v62 = vpop.eup %1836 }
 0x1fc   :  { %v670_v34 = vmul.f32 256.0, %v1837_v62  ;;  %vm674_vm0 = vweird.f32 %v1837_v62 }
 0x1fd   :  { %v656_v22 = vadd.f32 %v655_v17, %v2548_v18 }
 0x1fe   :  { %v671_v51 = vsub.f32 1.0, %v670_v34 }
 0x202   :  { %v615_v13 = vpop.f32.mrf.mxu2 }
 0x203   :  { %v2552_v19 = vadd.f32 %v2437_v4, %v615_v13 }
 0x205   :  { %v657_v2 = vadd.f32 %v656_v22, %v2552_v19 }
 0x20a   :  { %v617_v24 = vpop.f32.mrf.mxu2 }
 0x20b   :  { %v2556_v26 = vadd.f32 %v2437_v4, %v617_v24  ;;  %v672_v24 = vmul.f32 %v1837_v62, %v671_v51 }
 0x20d   :  { %v658_v29 = vadd.f32 %v657_v2, %v2556_v26  ;;  %v673_v39 = vadd.f32 %v1837_v62, %v672_v24 }
 0x20f   :  { %v2576_v36 = vsel %vm674_vm0, %v1837_v62, %v673_v39 }
 0x212   :  { %v620_v5 = vpop.f32.mrf.mxu2 }
 0x213   :  { %v2560_v28 = vadd.f32 %v2437_v4, %v620_v5 }
 0x215   :  { %v659_v35 = vadd.f32 %v658_v29, %v2560_v28 }
 0x21a   :  { %v622_v3 = vpop.f32.mrf.mxu2 }
 0x21b   :  { %v2564_v31 = vadd.f32 %v2437_v4, %v622_v3 }
 0x21d   :  { %v660_v43 = vadd.f32 %v659_v35, %v2564_v31 }
 0x222   :  { %v625_v27 = vpop.f32.mrf.mxu2 }
 0x223   :  { %v2568_v47 = vadd.f32 %v2437_v4, %v625_v27 }
 0x225   :  { %v661_v41 = vadd.f32 %v660_v43, %v2568_v47 }
 0x22a   :  { %v627_v58 = vpop.f32.mrf.mxu2 }
 0x22b   :  { %v2573_v11 = vadd.f32 %v2437_v4, %v627_v58 }
 0x22d   :  { %v662_v23 = vadd.f32 %v661_v41, %v2573_v11 }
 0x22f   :  { %v663_v13 = vrot.slane %v662_v23, 4 }
 0x231   :  { %v664_v49 = vadd.f32 %v663_v13, %v662_v23 }
 0x233   :  { %v665_v52 = vrot.slane %v664_v49, 2 }
 0x235   :  { %v666_v54 = vadd.f32 %v665_v52, %v664_v49 }
 0x237   :  { %v667_v15 = vrot.slane %v666_v54, 1 }
 0x239   :  { %v668_v56 = vadd.f32 %v667_v15, %v666_v54 }
 0x23b   :  { %v2579_v5 = vmul.f32 %v2576_v36, %v668_v56 }
 0x23d   :  { %v2583_v4 = vsub.f32 %v2445_v30, %v2579_v5  ;;  %v2587_v59 = vsub.f32 %v2441_v61, %v2579_v5  ;;  %v2591_v8 = vsub.f32 %v2449_v0, %v2579_v5  ;;  %v2599_v3 = vsub.f32 %v2455_v42, %v2579_v5 }
 0x23e   :  { %v2603_v30 = vsub.f32 %v2460_v50, %v2579_v5  ;;  %v2609_v0 = vsub.f32 %v2465_v55, %v2579_v5  ;;  %v2615_v42 = vsub.f32 %v2470_v20, %v2579_v5  ;;  %v2621_v27 = vsub.f32 %v2475_v21, %v2579_v5 }
 0x23f   :  { %v709_v9 = vmul.f32 %v2583_v4, %v2583_v4  ;;  %v710_v33 = vmul.f32 %v2587_v59, %v2587_v59  ;;  %v711_v61 = vmul.f32 %v2591_v8, %v2591_v8  ;;  %v712_v16 = vmul.f32 %v2599_v3, %v2599_v3 }
 0x240   :  { %v713_v50 = vmul.f32 %v2603_v30, %v2603_v30  ;;  %v714_v55 = vmul.f32 %v2609_v0, %v2609_v0  ;;  %v2627_v29 = vsub.f32 %v2480_v46, %v2579_v5  ;;  %v715_v20 = vmul.f32 %v2615_v42, %v2615_v42 }
 0x241   :  { %v741_v7 = vadd.f32 %v710_v33, %v709_v9  ;;  %v2633_v35 = vsub.f32 %v2484_v12, %v2579_v5  ;;  %v716_v21 = vmul.f32 %v2621_v27, %v2621_v27  ;;  %v2639_v58 = vsub.f32 %v2488_v44, %v2579_v5 }
 0x242   :  { %v717_v46 = vmul.f32 %v2627_v29, %v2627_v29  ;;  %v2645_v41 = vsub.f32 %v2492_v45, %v2579_v5  ;;  %v2651_v34 = vsub.f32 %v2496_v40, %v2579_v5  ;;  %v2657_v49 = vsub.f32 %v2500_v48, %v2579_v5 }
 0x243   :  { %v742_v17 = vadd.f32 %v741_v7, %v711_v61  ;;  %v718_v12 = vmul.f32 %v2633_v35, %v2633_v35  ;;  %v719_v44 = vmul.f32 %v2639_v58, %v2639_v58  ;;  %v2663_v52 = vsub.f32 %v2504_v53, %v2579_v5 }
 0x244   :  { %v720_v45 = vmul.f32 %v2645_v41, %v2645_v41  ;;  %v721_v40 = vmul.f32 %v2651_v34, %v2651_v34  ;;  %v2669_v24 = vsub.f32 %v2508_v14, %v2579_v5  ;;  %v722_v48 = vmul.f32 %v2657_v49, %v2657_v49 }
 0x245   :  { %v743_v22 = vadd.f32 %v742_v17, %v712_v16  ;;  %v2675_v39 = vsub.f32 %v2512_v38, %v2579_v5  ;;  %v723_v53 = vmul.f32 %v2663_v52, %v2663_v52  ;;  %v2681_v9 = vsub.f32 %v2516_v25, %v2579_v5 }
 0x246   :  { %v724_v14 = vmul.f32 %v2669_v24, %v2669_v24  ;;  %v2687_v61 = vsub.f32 %v2520_v57, %v2579_v5  ;;  %v2693_v16 = vsub.f32 %v2524_v37, %v2579_v5 }
 0x247   :  { %v744_v2 = vadd.f32 %v743_v22, %v713_v50  ;;  %v725_v38 = vmul.f32 %v2675_v39, %v2675_v39  ;;  %v726_v25 = vmul.f32 %v2681_v9, %v2681_v9  ;;  %v2699_v50 = vsub.f32 %v2528_v6, %v2579_v5 }
 0x248   :  { %v727_v57 = vmul.f32 %v2687_v61, %v2687_v61  ;;  %v728_v37 = vmul.f32 %v2693_v16, %v2693_v16 }
 0x249   :  { %v745_v1 = vadd.f32 %v744_v2, %v714_v55  ;;  %v2705_v55 = vsub.f32 %v2532_v60, %v2579_v5  ;;  %v729_v6 = vmul.f32 %v2699_v50, %v2699_v50 }
 0x24b   :  { %v746_v43 = vadd.f32 %v745_v1, %v715_v20  ;;  %v2711_v20 = vsub.f32 %v2536_v32, %v2579_v5  ;;  %v730_v60 = vmul.f32 %v2705_v55, %v2705_v55 }
 0x24d   :  { %v747_v62 = vadd.f32 %v746_v43, %v716_v21  ;;  %v2717_v21 = vsub.f32 %v2540_v63, %v2579_v5  ;;  %v731_v32 = vmul.f32 %v2711_v20, %v2711_v20 }
 0x24f   :  { %v748_v23 = vadd.f32 %v747_v62, %v717_v46  ;;  %v2723_v46 = vsub.f32 %v2544_v10, %v2579_v5  ;;  %v732_v63 = vmul.f32 %v2717_v21, %v2717_v21 }
 0x251   :  { %v749_v13 = vadd.f32 %v748_v23, %v718_v12  ;;  %v2729_v12 = vsub.f32 %v2548_v18, %v2579_v5  ;;  %v733_v10 = vmul.f32 %v2723_v46, %v2723_v46 }
 0x253   :  { %v750_v51 = vadd.f32 %v749_v13, %v719_v44  ;;  %v2735_v44 = vsub.f32 %v2552_v19, %v2579_v5  ;;  %v734_v18 = vmul.f32 %v2729_v12, %v2729_v12 }
 0x255   :  { %v751_v54 = vadd.f32 %v750_v51, %v720_v45  ;;  %v2741_v45 = vsub.f32 %v2556_v26, %v2579_v5  ;;  %v735_v19 = vmul.f32 %v2735_v44, %v2735_v44  ;;  %v955_v26 = vld [vmem:[%s4099_s4 + $0x78] sm:$0xff] }
 0x257   :  { %v752_v15 = vadd.f32 %v751_v54, %v721_v40  ;;  %v2747_v40 = vsub.f32 %v2560_v28, %v2579_v5  ;;  %v736_v28 = vmul.f32 %v2741_v45, %v2741_v45 }
 0x259   :  { %v753_v56 = vadd.f32 %v752_v15, %v722_v48  ;;  %v954_v48 = vld [vmem:[%s4099_s4 + $0x70] sm:$0xff] }
 0x25a   :  { %v963_v15 = vpack.c.bf16 %v955_v26, %v954_v48  ;;  %v945_v48 = vld [vmem:[%s4099_s4 + $0x28] sm:$0xff] }
 0x25b   :  { %v754_v33 = vadd.f32 %v753_v56, %v723_v53  ;;  %v2759_v53 = vsub.f32 %v2564_v31, %v2579_v5  ;;  %v953_v31 = vld [vmem:[%s4099_s4 + $0x68] sm:$0xff] }
 0x25c   :  { %968 = vmatpush.bf16.msra.mxu3 %v963_v15 }
 0x25d   :  { %v755_v7 = vadd.f32 %v754_v33, %v724_v14  ;;  %v2765_v14 = vsub.f32 %v2568_v47, %v2579_v5  ;;  %v737_v33 = vmul.f32 %v2747_v40, %v2747_v40  ;;  %v738_v47 = vmul.f32 %v2759_v53, %v2759_v53 }
 0x25f   :  { %v756_v17 = vadd.f32 %v755_v7, %v725_v38  ;;  %v952_v7 = vld [vmem:[%s4099_s4 + $0x60] sm:$0xff] }
 0x261   :  { %v757_v22 = vadd.f32 %v756_v17, %v726_v25  ;;  %v962_v25 = vpack.c.bf16 %v953_v31, %v952_v7  ;;  %v708_v17 = vsub.f32 %v2573_v11, %v2579_v5  ;;  %v940_v31 = vld [vmem:[%s4099_s4] sm:$0xff] }
 0x263   :  { %v758_v2 = vadd.f32 %v757_v22, %v727_v57  ;;  %969 = vmatpush.bf16.msra.mxu3 %v962_v25  ;;  %v739_v22 = vmul.f32 %v2765_v14, %v2765_v14  ;;  %v941_v25 = vld [vmem:[%s4099_s4 + $0x8] sm:$0xff] }
 0x265   :  { %v759_v1 = vadd.f32 %v758_v2, %v728_v37  ;;  %v950_v2 = vld [vmem:[%s4099_s4 + $0x50] sm:$0xff] }
 0x267   :  { %v760_v43 = vadd.f32 %v759_v1, %v729_v6  ;;  %v951_v6 = vld [vmem:[%s4099_s4 + $0x58] sm:$0xff] }
 0x268   :  { %v961_v1 = vpack.c.bf16 %v951_v6, %v950_v2 }
 0x269   :  { %v761_v62 = vadd.f32 %v760_v43, %v730_v60  ;;  %v740_v60 = vmul.f32 %v708_v17, %v708_v17  ;;  %v948_v43 = vld [vmem:[%s4099_s4 + $0x40] sm:$0xff] }
 0x26a   :  { %970 = vmatpush.bf16.msra.mxu3 %v961_v1 }
 0x26b   :  { %v762_v23 = vadd.f32 %v761_v62, %v731_v32  ;;  %v949_v32 = vld [vmem:[%s4099_s4 + $0x48] sm:$0xff] }
 0x26c   :  { %v960_v62 = vpack.c.bf16 %v949_v32, %v948_v43 }
 0x26d   :  { %v763_v13 = vadd.f32 %v762_v23, %v732_v63 }
 0x26e   :  { %971 = vmatpush.bf16.msra.mxu3 %v960_v62 }
 0x26f   :  { %v764_v51 = vadd.f32 %v763_v13, %v733_v10  ;;  %v946_v10 = vld [vmem:[%s4099_s4 + $0x30] sm:$0xff]  ;;  %v947_v13 = vld [vmem:[%s4099_s4 + $0x38] sm:$0xff] }
 0x271   :  { %v765_v54 = vadd.f32 %v764_v51, %v734_v18  ;;  %v959_v18 = vpack.c.bf16 %v947_v13, %v946_v10 }
 0x273   :  { %v766_v56 = vadd.f32 %v765_v54, %v735_v19  ;;  %972 = vmatpush.bf16.msra.mxu3 %v959_v18  ;;  %v944_v54 = vld [vmem:[%s4099_s4 + $0x20] sm:$0xff] }
 0x274   :  { %v958_v26 = vpack.c.bf16 %v945_v48, %v944_v54 }
 0x275   :  { %v767_v38 = vadd.f32 %v766_v56, %v736_v28  ;;  %v942_v56 = vld [vmem:[%s4099_s4 + $0x10] sm:$0xff] }
 0x277   :  { %v768_v57 = vadd.f32 %v767_v38, %v737_v33  ;;  %973 = vmatpush.bf16.msra.mxu3 %v958_v26  ;;  %v943_v33 = vld [vmem:[%s4099_s4 + $0x18] sm:$0xff] }
 0x278   :  { %v957_v38 = vpack.c.bf16 %v943_v33, %v942_v56 }
 0x279   :  { %v769_v37 = vadd.f32 %v768_v57, %v738_v47  ;;  %v956_v47 = vpack.c.bf16 %v941_v25, %v940_v31 }
 0x27b   :  { %v770_v11 = vadd.f32 %v769_v37, %v739_v22  ;;  %974 = vmatpush.bf16.msra.mxu3 %v957_v38 }
 0x27d   :  { %v771_v5 = vadd.f32 %v770_v11, %v740_v60  ;;  %v2821_v11 = vld [vmem:[%s4097_s7] ss:$0 sm:$0xff] }
 0x27f   :  { %v772_v63 = vrot.slane %v771_v5, 4  ;;  %975 = vmatpush.bf16.msra.mxu3 %v956_v47 }
 0x281   :  { %v773_v23 = vadd.f32 %v772_v63, %v771_v5 }
 0x283   :  { %v774_v51 = vrot.slane %v773_v23, 2 }
 0x285   :  { %v775_v19 = vadd.f32 %v774_v51, %v773_v23 }
 0x287   :  { %v776_v15 = vrot.slane %v775_v19, 1 }
 0x289   :  { %v777_v28 = vadd.f32 %v776_v15, %v775_v19 }
 0x28b   :  { %v778_v7 = vmul.f32 %v777_v28, %v2576_v36 }
 0x28d   :  { %v779_v57 = vadd.f32 1e-05, %v778_v7 }
 0x28f   :  { %1838 = vrsqrt.f32 %v779_v57  ;;  %vm786_vm2 = vweird.f32 %v779_v57 }
 0x295   :  { %v1839_v22 = vpop.eup %1838 }
 0x296   :  { %v781_v37 = vmul.f32 %v1839_v22, %v779_v57  ;;  %vm787_vm1 = vweird.f32 %v1839_v22 }
 0x297   :  { %vm788_vm3 = vmor %vm786_vm2, %vm787_vm1 }
 0x298   :  { %v782_v2 = vmul.f32 %v1839_v22, %v781_v37 }
 0x29a   :  { %v783_v6 = vmul.f32 0.5, %v782_v2 }
 0x29c   :  { %v784_v1 = vsub.f32 1.5, %v783_v6 }
 0x29e   :  { %v785_v60 = vmul.f32 %v1839_v22, %v784_v1 }
 0x2a0   :  { %v2823_v5 = vsel %vm788_vm3, %v1839_v22, %v785_v60 }
 0x2a1   :  { %v821_v43 = vmul.f32 %v2823_v5, %v708_v17  ;;  %v790_v62 = vmul.f32 %v2823_v5, %v2583_v4  ;;  %v791_v63 = vmul.f32 %v2823_v5, %v2587_v59  ;;  %v792_v23 = vmul.f32 %v2823_v5, %v2591_v8 }
 0x2a2   :  { %v793_v10 = vmul.f32 %v2823_v5, %v2599_v3  ;;  %v2839_v13 = vmul.f32 %v2823_v5, %v2603_v30  ;;  %v2843_v17 = vmul.f32 %v2823_v5, %v2609_v0  ;;  %v798_v4 = vmul.f32 %v2823_v5, %v2627_v29  ;;  %v2856_v30 = vld [vmem:[%s4098_s8] ss:$0 sm:$0xff] }
 0x2a3   :  { %v2827_v32 = vmul.f32 %v2821_v11, %v821_v43  ;;  %v799_v59 = vmul.f32 %v2823_v5, %v2633_v35  ;;  %v814_v8 = vmul.f32 %v2823_v5, %v2723_v46  ;;  %v815_v3 = vmul.f32 %v2823_v5, %v2729_v12 }
 0x2a4   :  { %v816_v0 = vmul.f32 %v2823_v5, %v2735_v44  ;;  %v817_v29 = vmul.f32 %v2823_v5, %v2741_v45  ;;  %v818_v35 = vmul.f32 %v2823_v5, %v2747_v40  ;;  %v819_v46 = vmul.f32 %v2823_v5, %v2759_v53 }
 0x2a5   :  { %v820_v12 = vmul.f32 %v2823_v5, %v2765_v14  ;;  %v2869_v18 = vmul.f32 %v2821_v11, %v814_v8  ;;  %v2872_v51 = vmul.f32 %v2821_v11, %v815_v3  ;;  %v825_v44 = vmul.f32 %v2821_v11, %v790_v62 }
 0x2a6   :  { %v2876_v19 = vmul.f32 %v2821_v11, %v816_v0  ;;  %v2879_v45 = vmul.f32 %v2821_v11, %v817_v29  ;;  %v2882_v40 = vmul.f32 %v2821_v11, %v818_v35  ;;  %v2885_v53 = vmul.f32 %v2821_v11, %v819_v46 }
 0x2a7   :  { %v2888_v14 = vmul.f32 %v2821_v11, %v820_v12  ;;  %v826_v54 = vmul.f32 %v2821_v11, %v791_v63  ;;  %v860_v48 = vadd.f32 %v2856_v30, %v825_v44  ;;  %v827_v26 = vmul.f32 %v2821_v11, %v792_v23 }
 0x2a8   :  { %v800_v15 = vmul.f32 %v2823_v5, %v2639_v58  ;;  %v801_v28 = vmul.f32 %v2823_v5, %v2645_v41  ;;  %v802_v56 = vmul.f32 %v2823_v5, %v2651_v34  ;;  %v828_v33 = vmul.f32 %v2821_v11, %v793_v10 }
 0x2a9   :  { %v803_v38 = vmul.f32 %v2823_v5, %v2657_v49  ;;  %v861_v7 = vadd.f32 %v2856_v30, %v826_v54  ;;  %v892_v31 = vmax.f32 %v860_v48, 0.0  ;;  %v862_v25 = vadd.f32 %v2856_v30, %v827_v26 }
 0x2aa   :  { %v804_v47 = vmul.f32 %v2823_v5, %v2663_v52  ;;  %v805_v58 = vmul.f32 %v2823_v5, %v2669_v24  ;;  %v806_v41 = vmul.f32 %v2823_v5, %v2675_v39  ;;  %v863_v34 = vadd.f32 %v2856_v30, %v828_v33 }
 0x2ab   :  { %v807_v57 = vmul.f32 %v2823_v5, %v2681_v9  ;;  %v893_v49 = vmax.f32 %v861_v7, 0.0  ;;  %v894_v22 = vmax.f32 %v862_v25, 0.0  ;;  %v833_v37 = vmul.f32 %v2821_v11, %v798_v4 }
 0x2ac   :  { %v808_v2 = vmul.f32 %v2823_v5, %v2687_v61  ;;  %v809_v52 = vmul.f32 %v2823_v5, %v2693_v16  ;;  %v810_v24 = vmul.f32 %v2823_v5, %v2699_v50  ;;  %v895_v6 = vmax.f32 %v863_v34, 0.0 }
 0x2ad   :  { %v811_v39 = vmul.f32 %v2823_v5, %v2705_v55  ;;  %v924_v1 = vpack.c.bf16 %v893_v49, %v892_v31  ;;  %v834_v9 = vmul.f32 %v2821_v11, %v799_v59  ;;  %v868_v60 = vadd.f32 %v2856_v30, %v833_v37 }
 0x2ae   :  { %v812_v43 = vmul.f32 %v2823_v5, %v2711_v20  ;;  %v813_v61 = vmul.f32 %v2823_v5, %v2717_v21  ;;  %v835_v16 = vmul.f32 %v2821_v11, %v800_v15  ;;  %v836_v62 = vmul.f32 %v2821_v11, %v801_v28 }
 0x2af   :  { %976 = vmatmul.bf16.vlgmr.msra.gmra.mxu3 %v924_v1  ;;  %v2930_v50 = vpack.c.bf16 %v895_v6, %v894_v22  ;;  %v869_v55 = vadd.f32 %v2856_v30, %v834_v9  ;;  %v900_v63 = vmax.f32 %v868_v60, 0.0  ;;  %v837_v23 = vmul.f32 %v2821_v11, %v802_v56 }
 0x2b0   :  { %v870_v10 = vadd.f32 %v2856_v30, %v835_v16  ;;  %v871_v4 = vadd.f32 %v2856_v30, %v836_v62  ;;  %v838_v20 = vmul.f32 %v2821_v11, %v803_v38  ;;  %v839_v21 = vmul.f32 %v2821_v11, %v804_v47 }
 0x2b1   :  { %v901_v59 = vmax.f32 %v869_v55, 0.0  ;;  %v872_v8 = vadd.f32 %v2856_v30, %v837_v23  ;;  %v840_v3 = vmul.f32 %v2821_v11, %v805_v58  ;;  %v841_v0 = vmul.f32 %v2821_v11, %v806_v41 }
 0x2b2   :  { %v902_v29 = vmax.f32 %v870_v10, 0.0  ;;  %v903_v35 = vmax.f32 %v871_v4, 0.0  ;;  %v873_v46 = vadd.f32 %v2856_v30, %v838_v20  ;;  %v874_v12 = vadd.f32 %v2856_v30, %v839_v21 }
 0x2b3   :  { %v2943_v44 = vpack.c.bf16 %v901_v59, %v900_v63  ;;  %v904_v54 = vmax.f32 %v872_v8, 0.0  ;;  %v875_v48 = vadd.f32 %v2856_v30, %v840_v3  ;;  %v842_v26 = vmul.f32 %v2821_v11, %v807_v57 }
 0x2b4   :  { %v2947_v15 = vpack.c.bf16 %v903_v35, %v902_v29  ;;  %v905_v28 = vmax.f32 %v873_v46, 0.0  ;;  %v906_v56 = vmax.f32 %v874_v12, 0.0  ;;  %v876_v33 = vadd.f32 %v2856_v30, %v841_v0 }
 0x2b5   :  { %v907_v38 = vmax.f32 %v875_v48, 0.0  ;;  %v877_v7 = vadd.f32 %v2856_v30, %v842_v26  ;;  %v843_v31 = vmul.f32 %v2821_v11, %v808_v2  ;;  %v844_v25 = vmul.f32 %v2821_v11, %v809_v52 }
 0x2b6   :  { %v2953_v47 = vpack.c.bf16 %v905_v28, %v904_v54  ;;  %v908_v58 = vmax.f32 %v876_v33, 0.0  ;;  %v845_v41 = vmul.f32 %v2821_v11, %v810_v24  ;;  %v846_v34 = vmul.f32 %v2821_v11, %v811_v39 }
 0x2b7   :  { %v931_v57 = vpack.c.bf16 %v907_v38, %v906_v56  ;;  %v909_v49 = vmax.f32 %v877_v7, 0.0  ;;  %v878_v22 = vadd.f32 %v2856_v30, %v843_v31  ;;  %v879_v37 = vadd.f32 %v2856_v30, %v844_v25 }
 0x2b8   :  { %v880_v6 = vadd.f32 %v2856_v30, %v845_v41  ;;  %v881_v1 = vadd.f32 %v2856_v30, %v846_v34  ;;  %v847_v2 = vmul.f32 %v2821_v11, %v812_v43  ;;  %v848_v52 = vmul.f32 %v2821_v11, %v813_v61 }
 0x2b9   :  { %v932_v9 = vpack.c.bf16 %v909_v49, %v908_v58  ;;  %v910_v60 = vmax.f32 %v878_v22, 0.0  ;;  %v911_v16 = vmax.f32 %v879_v37, 0.0  ;;  %v884_v24 = vadd.f32 %v2856_v30, %v2869_v18 }
 0x2ba   :  { %v912_v39 = vmax.f32 %v880_v6, 0.0  ;;  %v913_v62 = vmax.f32 %v881_v1, 0.0  ;;  %v882_v55 = vadd.f32 %v2856_v30, %v847_v2  ;;  %v883_v63 = vadd.f32 %v2856_v30, %v848_v52 }
 0x2bb   :  { %v933_v23 = vpack.c.bf16 %v911_v16, %v910_v60  ;;  %v885_v10 = vadd.f32 %v2856_v30, %v2872_v51  ;;  %v916_v4 = vmax.f32 %v884_v24, 0.0  ;;  %v886_v43 = vadd.f32 %v2856_v30, %v2876_v19 }
 0x2bc   :  { %v934_v61 = vpack.c.bf16 %v913_v62, %v912_v39  ;;  %v914_v20 = vmax.f32 %v882_v55, 0.0  ;;  %v915_v21 = vmax.f32 %v883_v63, 0.0  ;;  %v887_v18 = vadd.f32 %v2856_v30, %v2879_v45 }
 0x2bd   :  { %v917_v59 = vmax.f32 %v885_v10, 0.0  ;;  %v918_v8 = vmax.f32 %v886_v43, 0.0  ;;  %v888_v3 = vadd.f32 %v2856_v30, %v2882_v40  ;;  %v889_v0 = vadd.f32 %v2856_v30, %v2885_v53  ;;  %v3002_v10 = vld [vmem:[%s4100_s6] ss:$0 sm:$0xff] }
 0x2be   :  { %v935_v29 = vpack.c.bf16 %v915_v21, %v914_v20  ;;  %v919_v51 = vmax.f32 %v887_v18, 0.0  ;;  %v890_v35 = vadd.f32 %v2856_v30, %v2888_v14  ;;  %v891_v19 = vadd.f32 %v2856_v30, %v2827_v32 }
 0x2bf   :  { %981 = vmatmul.bf16.gmra.mxu3 %v2930_v50  ;;  %v936_v46 = vpack.c.bf16 %v917_v59, %v916_v4  ;;  %v920_v45 = vmax.f32 %v888_v3, 0.0  ;;  %v921_v12 = vmax.f32 %v889_v0, 0.0  ;;  %v829_v40 = vmul.f32 %v2821_v11, %v2839_v13 }
 0x2c0   :  { %v937_v54 = vpack.c.bf16 %v919_v51, %v918_v8  ;;  %v922_v48 = vmax.f32 %v890_v35, 0.0  ;;  %v923_v26 = vmax.f32 %v891_v19, 0.0  ;;  %v830_v53 = vmul.f32 %v2821_v11, %v2843_v17 }
 0x2c1   :  { %v938_v28 = vpack.c.bf16 %v921_v12, %v920_v45  ;;  %v864_v14 = vadd.f32 %v2856_v30, %v829_v40  ;;  %v796_v38 = vmul.f32 %v2823_v5, %v2615_v42  ;;  %v797_v7 = vmul.f32 %v2823_v5, %v2621_v27 }
 0x2c2   :  { %v939_v56 = vpack.c.bf16 %v923_v26, %v922_v48  ;;  %v865_v32 = vadd.f32 %v2856_v30, %v830_v53 }
 0x2c3   :  { %v896_v33 = vmax.f32 %v864_v14, 0.0  ;;  %v831_v13 = vmul.f32 %v2821_v11, %v796_v38  ;;  %v832_v17 = vmul.f32 %v2821_v11, %v797_v7 }
 0x2c4   :  { %v897_v50 = vmax.f32 %v865_v32, 0.0 }
 0x2c5   :  { %v866_v25 = vadd.f32 %v2856_v30, %v831_v13  ;;  %v867_v58 = vadd.f32 %v2856_v30, %v832_v17 }
 0x2c6   :  { %v926_v31 = vpack.c.bf16 %v897_v50, %v896_v33 }
 0x2c7   :  { %v898_v41 = vmax.f32 %v866_v25, 0.0  ;;  %v899_v34 = vmax.f32 %v867_v58, 0.0 }
 0x2c9   :  { %v927_v49 = vpack.c.bf16 %v899_v34, %v898_v41 }
 0x2cf   :  { %986 = vmatmul.bf16.gmra.mxu3 %v926_v31 }
 0x2df   :  { %991 = vmatmul.bf16.gmra.mxu3 %v927_v49 }
 0x2ef   :  { %996 = vmatmul.bf16.gmra.mxu3 %v2943_v44 }
 0x2ff   :  { %1001 = vmatmul.bf16.gmra.mxu3 %v2947_v15 }
 0x30f   :  { %1006 = vmatmul.bf16.gmra.mxu3 %v2953_v47 }
 0x31f   :  { %1011 = vmatmul.bf16.gmra.mxu3 %v931_v57 }
 0x32f   :  { %1016 = vmatmul.bf16.gmra.mxu3 %v932_v9 }
 0x332   :  { %v977_v42 = vpop.f32.mrf.mxu3 }
 0x333   :  { %v3008_v43 = vadd.f32 %v3002_v10, %v977_v42 }
 0x33a   :  { %v979_v27 = vpop.f32.mrf.mxu3 }
 0x33b   :  { %v3005_v4 = vadd.f32 %v3002_v10, %v979_v27 }
 0x33d   :  { %v1059_v20 = vadd.f32 %v3005_v4, %v3008_v43 }
 0x33f   :  { %1021 = vmatmul.bf16.gmra.mxu3 %v933_v23 }
 0x342   :  { %v982_v11 = vpop.f32.mrf.mxu3 }
 0x34a   :  { %v984_v5 = vpop.f32.mrf.mxu3 }
 0x34b   :  { %v3016_v21 = vadd.f32 %v3002_v10, %v984_v5 }
 0x34f   :  { %1026 = vmatmul.bf16.gmra.mxu3 %v934_v61  ;;  %v3011_v61 = vadd.f32 %v3002_v10, %v982_v11 }
 0x351   :  { %v1060_v59 = vadd.f32 %v1059_v20, %v3011_v61 }
 0x352   :  { %v987_v22 = vpop.f32.mrf.mxu3 }
 0x353   :  { %v3020_v8 = vadd.f32 %v3002_v10, %v987_v22  ;;  %v1061_v3 = vadd.f32 %v1060_v59, %v3016_v21 }
 0x35a   :  { %v989_v30 = vpop.f32.mrf.mxu3 }
 0x35b   :  { %v3024_v0 = vadd.f32 %v3002_v10, %v989_v30 }
 0x35f   :  { %1031 = vmatmul.bf16.gmra.mxu3 %v935_v29  ;;  %v1062_v29 = vadd.f32 %v1061_v3, %v3020_v8 }
 0x361   :  { %v1063_v35 = vadd.f32 %v1062_v29, %v3024_v0 }
 0x362   :  { %v992_v37 = vpop.f32.mrf.mxu3 }
 0x363   :  { %v3028_v51 = vadd.f32 %v3002_v10, %v992_v37 }
 0x365   :  { %v1064_v45 = vadd.f32 %v1063_v35, %v3028_v51 }
 0x36a   :  { %v994_v6 = vpop.f32.mrf.mxu3 }
 0x36b   :  { %v3032_v19 = vadd.f32 %v3002_v10, %v994_v6 }
 0x36f   :  { %1036 = vmatmul.bf16.gmra.mxu3 %v936_v46 }
 0x372   :  { %v997_v1 = vpop.f32.mrf.mxu3 }
 0x373   :  { %v3036_v12 = vadd.f32 %v3002_v10, %v997_v1 }
 0x37a   :  { %v999_v44 = vpop.f32.mrf.mxu3 }
 0x37b   :  { %v3040_v48 = vadd.f32 %v3002_v10, %v999_v44 }
 0x37f   :  { %1041 = vmatmul.bf16.gmra.mxu3 %v937_v54  ;;  %v1065_v54 = vadd.f32 %v1064_v45, %v3032_v19 }
 0x381   :  { %v1066_v26 = vadd.f32 %v1065_v54, %v3036_v12 }
 0x382   :  { %v1002_v15 = vpop.f32.mrf.mxu3 }
 0x383   :  { %v3044_v40 = vadd.f32 %v3002_v10, %v1002_v15  ;;  %v1067_v53 = vadd.f32 %v1066_v26, %v3040_v48 }
 0x385   :  { %v1068_v14 = vadd.f32 %v1067_v53, %v3044_v40 }
 0x38a   :  { %v1004_v2 = vpop.f32.mrf.mxu3 }
 0x38f   :  { %1046 = vmatmul.bf16.gmra.mxu3 %v938_v28  ;;  %v3048_v28 = vadd.f32 %v3002_v10, %v1004_v2 }
 0x391   :  { %v1069_v33 = vadd.f32 %v1068_v14, %v3048_v28 }
 0x392   :  { %v1007_v47 = vpop.f32.mrf.mxu3 }
 0x393   :  { %v3052_v32 = vadd.f32 %v3002_v10, %v1007_v47 }
 0x395   :  { %v1070_v38 = vadd.f32 %v1069_v33, %v3052_v32 }
 0x39a   :  { %v1009_v57 = vpop.f32.mrf.mxu3 }
 0x39b   :  { %v3056_v50 = vadd.f32 %v3002_v10, %v1009_v57 }
 0x39d   :  { %v1071_v31 = vadd.f32 %v1070_v38, %v3056_v50 }
 0x39f   :  { %1051 = vmatmul.bf16.gmra.mxu3 %v939_v56 }
 0x3a2   :  { %v1012_v52 = vpop.f32.mrf.mxu3 }
 0x3a3   :  { %v3060_v7 = vadd.f32 %v3002_v10, %v1012_v52 }
 0x3a5   :  { %v1072_v25 = vadd.f32 %v1071_v31, %v3060_v7 }
 0x3aa   :  { %v1014_v9 = vpop.f32.mrf.mxu3 }
 0x3ab   :  { %v3064_v13 = vadd.f32 %v3002_v10, %v1014_v9 }
 0x3ad   :  { %v1073_v41 = vadd.f32 %v1072_v25, %v3064_v13 }
 0x3b2   :  { %v1017_v60 = vpop.f32.mrf.mxu3 }
 0x3b3   :  { %v3068_v58 = vadd.f32 %v3002_v10, %v1017_v60 }
 0x3b5   :  { %v1074_v49 = vadd.f32 %v1073_v41, %v3068_v58 }
 0x3ba   :  { %v1019_v16 = vpop.f32.mrf.mxu3 }
 0x3bb   :  { %v3072_v34 = vadd.f32 %v3002_v10, %v1019_v16 }
 0x3bd   :  { %v1075_v27 = vadd.f32 %v1074_v49, %v3072_v34 }
 0x3c2   :  { %v1022_v24 = vpop.f32.mrf.mxu3 }
 0x3c3   :  { %v3076_v42 = vadd.f32 %v3002_v10, %v1022_v24 }
 0x3c5   :  { %v1076_v22 = vadd.f32 %v1075_v27, %v3076_v42 }
 0x3ca   :  { %v1024_v39 = vpop.f32.mrf.mxu3 }
 0x3cb   :  { %v3080_v11 = vadd.f32 %v3002_v10, %v1024_v39 }
 0x3cd   :  { %v1077_v37 = vadd.f32 %v1076_v22, %v3080_v11 }
 0x3d2   :  { %v1027_v62 = vpop.f32.mrf.mxu3 }
 0x3d3   :  { %v3084_v30 = vadd.f32 %v3002_v10, %v1027_v62 }
 0x3d5   :  { %v1078_v1 = vadd.f32 %v1077_v37, %v3084_v30 }
 0x3da   :  { %v1029_v55 = vpop.f32.mrf.mxu3 }
 0x3db   :  { %v3088_v6 = vadd.f32 %v3002_v10, %v1029_v55 }
 0x3dd   :  { %v1079_v15 = vadd.f32 %v1078_v1, %v3088_v6 }
 0x3e2   :  { %v1032_v63 = vpop.f32.mrf.mxu3 }
 0x3e3   :  { %v3092_v44 = vadd.f32 %v3002_v10, %v1032_v63 }
 0x3e5   :  { %v1080_v57 = vadd.f32 %v1079_v15, %v3092_v44 }
 0x3ea   :  { %v1034_v23 = vpop.f32.mrf.mxu3 }
 0x3eb   :  { %v3096_v2 = vadd.f32 %v3002_v10, %v1034_v23 }
 0x3ed   :  { %v1081_v9 = vadd.f32 %v1080_v57, %v3096_v2 }
 0x3f2   :  { %v1037_v18 = vpop.f32.mrf.mxu3 }
 0x3f3   :  { %v3100_v52 = vadd.f32 %v3002_v10, %v1037_v18 }
 0x3f5   :  { %v1082_v16 = vadd.f32 %v1081_v9, %v3100_v52 }
 0x3fa   :  { %v1039_v46 = vpop.f32.mrf.mxu3 }
 0x3fb   :  { %v3104_v60 = vadd.f32 %v3002_v10, %v1039_v46 }
 0x3fd   :  { %v1083_v39 = vadd.f32 %v1082_v16, %v3104_v60 }
 0x402   :  { %v1042_v56 = vpop.f32.mrf.mxu3 }
 0x403   :  { %v3108_v24 = vadd.f32 %v3002_v10, %v1042_v56 }
 0x405   :  { %v1084_v63 = vadd.f32 %v1083_v39, %v3108_v24 }
 0x40a   :  { %v1044_v17 = vpop.f32.mrf.mxu3 }
 0x40b   :  { %v3112_v62 = vadd.f32 %v3002_v10, %v1044_v17 }
 0x40d   :  { %v1085_v20 = vadd.f32 %v1084_v63, %v3112_v62 }
 0x412   :  { %v1047_v5 = vpop.f32.mrf.mxu3 }
 0x413   :  { %v3116_v23 = vadd.f32 %v3002_v10, %v1047_v5 }
 0x415   :  { %v1086_v59 = vadd.f32 %v1085_v20, %v3116_v23 }
 0x41a   :  { %v1049_v47 = vpop.f32.mrf.mxu3 }
 0x41b   :  { %v3120_v18 = vadd.f32 %v3002_v10, %v1049_v47 }
 0x41d   :  { %v1087_v29 = vadd.f32 %v1086_v59, %v3120_v18 }
 0x422   :  { %v1052_v55 = vpop.f32.mrf.mxu3 }
 0x423   :  { %v3124_v3 = vadd.f32 %v3002_v10, %v1052_v55 }
 0x425   :  { %v1088_v46 = vadd.f32 %v1087_v29, %v3124_v3 }
 0x42a   :  { %v1054_v35 = vpop.f32.mrf.mxu3 }
 0x42b   :  { %v3129_v45 = vadd.f32 %v3002_v10, %v1054_v35 }
 0x42d   :  { %v1089_v54 = vadd.f32 %v1088_v46, %v3129_v45 }
 0x42f   :  { %v1090_v26 = vrot.slane %v1089_v54, 4 }
 0x431   :  { %v1091_v53 = vadd.f32 %v1090_v26, %v1089_v54 }
 0x433   :  { %v1092_v56 = vrot.slane %v1091_v53, 2 }
 0x435   :  { %v1093_v14 = vadd.f32 %v1092_v56, %v1091_v53 }
 0x437   :  { %v1094_v33 = vrot.slane %v1093_v14, 1 }
 0x439   :  { %v1095_v38 = vadd.f32 %v1094_v33, %v1093_v14 }
 0x43b   :  { %v3133_v31 = vmul.f32 %v1095_v38, %v2576_v36 }
 0x43d   :  { %v3137_v17 = vsub.f32 %v3008_v43, %v3133_v31  ;;  %v3141_v25 = vsub.f32 %v3005_v4, %v3133_v31  ;;  %v3145_v10 = vsub.f32 %v3011_v61, %v3133_v31  ;;  %v3153_v27 = vsub.f32 %v3016_v21, %v3133_v31 }
 0x43e   :  { %v3157_v43 = vsub.f32 %v3020_v8, %v3133_v31  ;;  %v3163_v61 = vsub.f32 %v3024_v0, %v3133_v31  ;;  %v3169_v21 = vsub.f32 %v3028_v51, %v3133_v31  ;;  %v3175_v15 = vsub.f32 %v3032_v19, %v3133_v31 }
 0x43f   :  { %v1129_v41 = vmul.f32 %v3137_v17, %v3137_v17  ;;  %v1130_v49 = vmul.f32 %v3141_v25, %v3141_v25  ;;  %v1131_v4 = vmul.f32 %v3145_v10, %v3145_v10  ;;  %v1132_v22 = vmul.f32 %v3153_v27, %v3153_v27 }
 0x440   :  { %v1133_v8 = vmul.f32 %v3157_v43, %v3157_v43  ;;  %v1134_v0 = vmul.f32 %v3163_v61, %v3163_v61  ;;  %v3181_v57 = vsub.f32 %v3036_v12, %v3133_v31  ;;  %v1135_v51 = vmul.f32 %v3169_v21, %v3169_v21 }
 0x441   :  { %v1161_v5 = vadd.f32 %v1130_v49, %v1129_v41  ;;  %v3187_v16 = vsub.f32 %v3040_v48, %v3133_v31  ;;  %v1136_v19 = vmul.f32 %v3175_v15, %v3175_v15  ;;  %v3193_v55 = vsub.f32 %v3044_v40, %v3133_v31 }
 0x442   :  { %v1137_v12 = vmul.f32 %v3181_v57, %v3181_v57  ;;  %v3199_v20 = vsub.f32 %v3048_v28, %v3133_v31  ;;  %v3205_v29 = vsub.f32 %v3052_v32, %v3133_v31  ;;  %v3211_v46 = vsub.f32 %v3056_v50, %v3133_v31 }
 0x443   :  { %v1162_v37 = vadd.f32 %v1161_v5, %v1131_v4  ;;  %v1138_v48 = vmul.f32 %v3187_v16, %v3187_v16  ;;  %v1139_v40 = vmul.f32 %v3193_v55, %v3193_v55  ;;  %v3217_v26 = vsub.f32 %v3060_v7, %v3133_v31 }
 0x444   :  { %v1140_v28 = vmul.f32 %v3199_v20, %v3199_v20  ;;  %v1141_v32 = vmul.f32 %v3205_v29, %v3205_v29  ;;  %v3223_v56 = vsub.f32 %v3064_v13, %v3133_v31  ;;  %v1142_v50 = vmul.f32 %v3211_v46, %v3211_v46 }
 0x445   :  { %v1163_v1 = vadd.f32 %v1162_v37, %v1132_v22  ;;  %v3229_v33 = vsub.f32 %v3068_v58, %v3133_v31  ;;  %v1143_v7 = vmul.f32 %v3217_v26, %v3217_v26  ;;  %v3235_v41 = vsub.f32 %v3072_v34, %v3133_v31 }
 0x446   :  { %v1144_v13 = vmul.f32 %v3223_v56, %v3223_v56  ;;  %v3241_v4 = vsub.f32 %v3076_v42, %v3133_v31  ;;  %v3247_v22 = vsub.f32 %v3080_v11, %v3133_v31 }
 0x447   :  { %v1164_v47 = vadd.f32 %v1163_v1, %v1133_v8  ;;  %v1145_v58 = vmul.f32 %v3229_v33, %v3229_v33  ;;  %v1146_v34 = vmul.f32 %v3235_v41, %v3235_v41  ;;  %v3253_v8 = vsub.f32 %v3084_v30, %v3133_v31 }
 0x448   :  { %v1147_v42 = vmul.f32 %v3241_v4, %v3241_v4  ;;  %v1148_v11 = vmul.f32 %v3247_v22, %v3247_v22 }
 0x449   :  { %v1165_v9 = vadd.f32 %v1164_v47, %v1134_v0  ;;  %v3259_v0 = vsub.f32 %v3088_v6, %v3133_v31  ;;  %v1149_v30 = vmul.f32 %v3253_v8, %v3253_v8 }
 0x44b   :  { %v1166_v39 = vadd.f32 %v1165_v9, %v1135_v51  ;;  %v3265_v51 = vsub.f32 %v3092_v44, %v3133_v31  ;;  %v1150_v6 = vmul.f32 %v3259_v0, %v3259_v0 }
 0x44d   :  { %v1167_v63 = vadd.f32 %v1166_v39, %v1136_v19  ;;  %v3271_v19 = vsub.f32 %v3096_v2, %v3133_v31  ;;  %v1151_v44 = vmul.f32 %v3265_v51, %v3265_v51 }
 0x44f   :  { %v1168_v59 = vadd.f32 %v1167_v63, %v1137_v12  ;;  %v3277_v12 = vsub.f32 %v3100_v52, %v3133_v31  ;;  %v1152_v2 = vmul.f32 %v3271_v19, %v3271_v19 }
 0x451   :  { %v1169_v35 = vadd.f32 %v1168_v59, %v1138_v48  ;;  %v3283_v48 = vsub.f32 %v3104_v60, %v3133_v31  ;;  %v1153_v52 = vmul.f32 %v3277_v12, %v3277_v12 }
 0x453   :  { %v1170_v54 = vadd.f32 %v1169_v35, %v1139_v40  ;;  %v3289_v40 = vsub.f32 %v3108_v24, %v3133_v31  ;;  %v1154_v60 = vmul.f32 %v3283_v48, %v3283_v48 }
 0x455   :  { %v1171_v53 = vadd.f32 %v1170_v54, %v1140_v28  ;;  %v3295_v28 = vsub.f32 %v3112_v62, %v3133_v31  ;;  %v1155_v24 = vmul.f32 %v3289_v40, %v3289_v40 }
 0x457   :  { %v1172_v14 = vadd.f32 %v1171_v53, %v1141_v32  ;;  %v3301_v32 = vsub.f32 %v3116_v23, %v3133_v31  ;;  %v1156_v62 = vmul.f32 %v3295_v28, %v3295_v28 }
 0x459   :  { %v1173_v38 = vadd.f32 %v1172_v14, %v1142_v50  ;;  %v3307_v50 = vsub.f32 %v3120_v18, %v3133_v31  ;;  %v1157_v23 = vmul.f32 %v3301_v32, %v3301_v32 }
 0x45b   :  { %v1174_v49 = vadd.f32 %v1173_v38, %v1143_v7  ;;  %v3313_v7 = vsub.f32 %v3124_v3, %v3133_v31  ;;  %v1158_v18 = vmul.f32 %v3307_v50, %v3307_v50 }
 0x45d   :  { %v1175_v5 = vadd.f32 %v1174_v49, %v1144_v13  ;;  %v3319_v13 = vsub.f32 %v3129_v45, %v3133_v31 }
 0x45f   :  { %v1176_v37 = vadd.f32 %v1175_v5, %v1145_v58  ;;  %v1159_v58 = vmul.f32 %v3313_v7, %v3313_v7  ;;  %v1160_v3 = vmul.f32 %v3319_v13, %v3319_v13 }
 0x461   :  { %v1177_v1 = vadd.f32 %v1176_v37, %v1146_v34 }
 0x463   :  { %v1178_v47 = vadd.f32 %v1177_v1, %v1147_v42 }
 0x465   :  { %v1179_v9 = vadd.f32 %v1178_v47, %v1148_v11 }
 0x467   :  { %v1180_v39 = vadd.f32 %v1179_v9, %v1149_v30 }
 0x469   :  { %v1181_v63 = vadd.f32 %v1180_v39, %v1150_v6 }
 0x46b   :  { %v1182_v59 = vadd.f32 %v1181_v63, %v1151_v44 }
 0x46d   :  { %v1183_v35 = vadd.f32 %v1182_v59, %v1152_v2 }
 0x46f   :  { %v1184_v54 = vadd.f32 %v1183_v35, %v1153_v52 }
 0x471   :  { %v1185_v53 = vadd.f32 %v1184_v54, %v1154_v60  ;;  %v3337_v54 = vld [vmem:[%s4101_s9] ss:$0 sm:$0xff] }
 0x473   :  { %v1186_v14 = vadd.f32 %v1185_v53, %v1155_v24 }
 0x475   :  { %v1187_v38 = vadd.f32 %v1186_v14, %v1156_v62  ;;  %v3346_v14 = vld [vmem:[%s4102_s10] ss:$0 sm:$0xff] }
 0x477   :  { %v1188_v49 = vadd.f32 %v1187_v38, %v1157_v23 }
 0x479   :  { %v1189_v5 = vadd.f32 %v1188_v49, %v1158_v18 }
 0x47b   :  { %v1190_v34 = vadd.f32 %v1189_v5, %v1159_v58 }
 0x47d   :  { %v1191_v37 = vadd.f32 %v1190_v34, %v1160_v3 }
 0x47f   :  { %v1192_v42 = vrot.slane %v1191_v37, 4 }
 0x481   :  { %v1193_v1 = vadd.f32 %v1192_v42, %v1191_v37 }
 0x483   :  { %v1194_v11 = vrot.slane %v1193_v1, 2 }
 0x485   :  { %v1195_v47 = vadd.f32 %v1194_v11, %v1193_v1 }
 0x487   :  { %v1196_v30 = vrot.slane %v1195_v47, 1 }
 0x489   :  { %v1197_v45 = vadd.f32 %v1196_v30, %v1195_v47 }
 0x48b   :  { %v1198_v31 = vmul.f32 %v1197_v45, %v2576_v36 }
 0x48d   :  { %v1199_v9 = vadd.f32 1e-05, %v1198_v31 }
 0x48f   :  { %1840 = vrsqrt.f32 %v1199_v9  ;;  %vm1206_vm5 = vweird.f32 %v1199_v9 }
 0x495   :  { %v1841_v6 = vpop.eup %1840 }
 0x496   :  { %v1201_v39 = vmul.f32 %v1841_v6, %v1199_v9  ;;  %vm1207_vm4 = vweird.f32 %v1841_v6 }
 0x497   :  { %vm1208_vm6 = vmor %vm1206_vm5, %vm1207_vm4 }
 0x498   :  { %v1202_v44 = vmul.f32 %v1841_v6, %v1201_v39 }
 0x49a   :  { %v1203_v63 = vmul.f32 0.5, %v1202_v44 }
 0x49c   :  { %v1204_v2 = vsub.f32 1.5, %v1203_v63 }
 0x49e   :  { %v1205_v59 = vmul.f32 %v1841_v6, %v1204_v2 }
 0x4a0   :  { %v3328_v52 = vsel %vm1208_vm6, %v1841_v6, %v1205_v59 }
 0x4a1   :  { %v1210_v35 = vmul.f32 %v3328_v52, %v3137_v17  ;;  %v1211_v60 = vmul.f32 %v3328_v52, %v3141_v25  ;;  %v1212_v24 = vmul.f32 %v3328_v52, %v3145_v10  ;;  %v1213_v17 = vmul.f32 %v3328_v52, %v3153_v27 }
 0x4a2   :  { %v1214_v25 = vmul.f32 %v3328_v52, %v3157_v43  ;;  %v1215_v18 = vmul.f32 %v3328_v52, %v3163_v61  ;;  %v1216_v58 = vmul.f32 %v3328_v52, %v3169_v21  ;;  %v1217_v34 = vmul.f32 %v3328_v52, %v3175_v15 }
 0x4a3   :  { %v1245_v53 = vmul.f32 %v3337_v54, %v1210_v35  ;;  %v1246_v62 = vmul.f32 %v3337_v54, %v1211_v60  ;;  %v1247_v23 = vmul.f32 %v3337_v54, %v1212_v24  ;;  %v1248_v49 = vmul.f32 %v3337_v54, %v1213_v17 }
 0x4a4   :  { %v1249_v27 = vmul.f32 %v3337_v54, %v1214_v25  ;;  %v1250_v37 = vmul.f32 %v3337_v54, %v1215_v18  ;;  %v1218_v21 = vmul.f32 %v3328_v52, %v3181_v57  ;;  %v1251_v42 = vmul.f32 %v3337_v54, %v1216_v58 }
 0x4a5   :  { %v3354_v38 = vadd.f32 %v3346_v14, %v1245_v53  ;;  %v3357_v10 = vadd.f32 %v3346_v14, %v1246_v62  ;;  %v3366_v43 = vadd.f32 %v3346_v14, %v1247_v23  ;;  %v3374_v61 = vadd.f32 %v3346_v14, %v1248_v49 }
 0x4a6   :  { %v3380_v1 = vadd.f32 %v3346_v14, %v1249_v27  ;;  %v1219_v47 = vmul.f32 %v3328_v52, %v3187_v16  ;;  %v1252_v30 = vmul.f32 %v3337_v54, %v1217_v34  ;;  %v3391_v45 = vadd.f32 %v3346_v14, %v1250_v37 }
 0x4a7   :  { %v1312_v5 = vmax.f32 %v3354_v38, 0.0  ;;  %v1313_v3 = vmax.f32 %v3357_v10, 0.0  ;;  %v1314_v11 = vmax.f32 %v3366_v43, 0.0  ;;  %v1315_v57 = vmax.f32 %v3374_v61, 0.0 }
 0x4a8   :  { %v1220_v9 = vmul.f32 %v3328_v52, %v3193_v55  ;;  %v1253_v6 = vmul.f32 %v3337_v54, %v1218_v21  ;;  %v3400_v39 = vadd.f32 %v3346_v14, %v1251_v42  ;;  %v1316_v16 = vmax.f32 %v3380_v1, 0.0 }
 0x4a9   :  { %v1346_v15 = vadd.f32 %v1313_v3, %v1312_v5  ;;  %v1221_v63 = vmul.f32 %v3328_v52, %v3199_v20  ;;  %v1254_v2 = vmul.f32 %v3337_v54, %v1219_v47  ;;  %v3409_v59 = vadd.f32 %v3346_v14, %v1252_v30 }
 0x4aa   :  { %v1317_v55 = vmax.f32 %v3391_v45, 0.0  ;;  %v1222_v60 = vmul.f32 %v3328_v52, %v3205_v29  ;;  %v1255_v24 = vmul.f32 %v3337_v54, %v1220_v9  ;;  %v3418_v53 = vadd.f32 %v3346_v14, %v1253_v6 }
 0x4ab   :  { %v1347_v31 = vadd.f32 %v1346_v15, %v1314_v11  ;;  %v1318_v20 = vmax.f32 %v3400_v39, 0.0  ;;  %v1223_v17 = vmul.f32 %v3328_v52, %v3211_v46  ;;  %v1256_v25 = vmul.f32 %v3337_v54, %v1221_v63 }
 0x4ac   :  { %v3427_v23 = vadd.f32 %v3346_v14, %v1254_v2  ;;  %v1319_v29 = vmax.f32 %v3409_v59, 0.0  ;;  %v1224_v49 = vmul.f32 %v3328_v52, %v3217_v26  ;;  %v1257_v58 = vmul.f32 %v3337_v54, %v1222_v60 }
 0x4ad   :  { %v1348_v44 = vadd.f32 %v1347_v31, %v1315_v57  ;;  %v3436_v27 = vadd.f32 %v3346_v14, %v1255_v24  ;;  %v1320_v46 = vmax.f32 %v3418_v53, 0.0  ;;  %v1225_v37 = vmul.f32 %v3328_v52, %v3223_v56 }
 0x4ae   :  { %v1258_v21 = vmul.f32 %v3337_v54, %v1223_v17  ;;  %v3445_v42 = vadd.f32 %v3346_v14, %v1256_v25  ;;  %v1321_v26 = vmax.f32 %v3427_v23, 0.0  ;;  %v1226_v47 = vmul.f32 %v3328_v52, %v3229_v33 }
 0x4af   :  { %v1349_v35 = vadd.f32 %v1348_v44, %v1316_v16  ;;  %v1259_v30 = vmul.f32 %v3337_v54, %v1224_v49  ;;  %v3454_v31 = vadd.f32 %v3346_v14, %v1257_v58  ;;  %v1322_v56 = vmax.f32 %v3436_v27, 0.0 }
 0x4b0   :  { %v1227_v6 = vmul.f32 %v3328_v52, %v3235_v41  ;;  %v1260_v44 = vmul.f32 %v3337_v54, %v1225_v37  ;;  %v3463_v63 = vadd.f32 %v3346_v14, %v1258_v21  ;;  %v1323_v33 = vmax.f32 %v3445_v42, 0.0 }
 0x4b1   :  { %v1350_v62 = vadd.f32 %v1349_v35, %v1317_v55  ;;  %v1228_v35 = vmul.f32 %v3328_v52, %v3241_v4  ;;  %v1261_v60 = vmul.f32 %v3337_v54, %v1226_v47  ;;  %v3472_v24 = vadd.f32 %v3346_v14, %v1259_v30 }
 0x4b2   :  { %v1324_v41 = vmax.f32 %v3454_v31, 0.0  ;;  %v1229_v17 = vmul.f32 %v3328_v52, %v3247_v22  ;;  %v1262_v25 = vmul.f32 %v3337_v54, %v1227_v6  ;;  %v1325_v4 = vmax.f32 %v3463_v63, 0.0 }
 0x4b3   :  { %v1351_v18 = vadd.f32 %v1350_v62, %v1318_v20  ;;  %v1230_v58 = vmul.f32 %v3328_v52, %v3253_v8  ;;  %v3490_v37 = vadd.f32 %v3346_v14, %v1261_v60  ;;  %v1326_v22 = vmax.f32 %v3472_v24, 0.0 }
 0x4b4   :  { %v1264_v47 = vmul.f32 %v3337_v54, %v1229_v17  ;;  %v3499_v30 = vadd.f32 %v3346_v14, %v1262_v25  ;;  %v1232_v6 = vmul.f32 %v3328_v52, %v3265_v51  ;;  %v1233_v60 = vmul.f32 %v3328_v52, %v3271_v19 }
 0x4b5   :  { %v1352_v34 = vadd.f32 %v1351_v18, %v1319_v29  ;;  %v3481_v18 = vadd.f32 %v3346_v14, %v1260_v44  ;;  %v1265_v44 = vmul.f32 %v3337_v54, %v1230_v58 }
 0x4b6   :  { %v3517_v17 = vadd.f32 %v3346_v14, %v1264_v47  ;;  %v4106_v51 = vmax.f32 %v3499_v30, 0.0  ;;  %v1267_v58 = vmul.f32 %v3337_v54, %v1232_v6  ;;  %v1268_v47 = vmul.f32 %v3337_v54, %v1233_v60 }
 0x4b7   :  { %v1353_v15 = vadd.f32 %v1352_v34, %v1320_v46  ;;  %v1263_v34 = vmul.f32 %v3337_v54, %v1228_v35  ;;  %v1327_v8 = vmax.f32 %v3481_v18, 0.0 }
 0x4b9   :  { %v1354_v9 = vadd.f32 %v1353_v15, %v1321_v26  ;;  %v1231_v15 = vmul.f32 %v3328_v52, %v3259_v0  ;;  %v4117_v0 = vmax.f32 %v3490_v37, 0.0 }
 0x4bb   :  { %v1355_v2 = vadd.f32 %v1354_v9, %v1322_v56 }
 0x4bd   :  { %v1356_v62 = vadd.f32 %v1355_v2, %v1323_v33  ;;  %v3508_v2 = vadd.f32 %v3346_v14, %v1263_v34  ;;  %v3526_v34 = vadd.f32 %v3346_v14, %v1265_v44  ;;  %v1236_v44 = vmul.f32 %v3328_v52, %v3289_v40 }
 0x4bf   :  { %v1357_v49 = vadd.f32 %v1356_v62, %v1324_v41  ;;  %v1266_v62 = vmul.f32 %v3337_v54, %v1231_v15  ;;  %v4107_v19 = vmax.f32 %v3508_v2, 0.0  ;;  %v1235_v15 = vmul.f32 %v3328_v52, %v3283_v48 }
 0x4c0   :  { %v4109_v48 = vmax.f32 %v3526_v34, 0.0 }
 0x4c1   :  { %v1358_v21 = vadd.f32 %v1357_v49, %v1325_v4  ;;  %v1234_v49 = vmul.f32 %v3328_v52, %v3277_v12  ;;  %v4108_v12 = vmax.f32 %v3517_v17, 0.0 }
 0x4c3   :  { %v1359_v9 = vadd.f32 %v1358_v21, %v1326_v22 }
 0x4c5   :  { %v1360_v35 = vadd.f32 %v1359_v9, %v1327_v8  ;;  %v3535_v9 = vadd.f32 %v3346_v14, %v1266_v62  ;;  %v1237_v62 = vmul.f32 %v3328_v52, %v3295_v28 }
 0x4c7   :  { %v1361_v25 = vadd.f32 %v1360_v35, %v4117_v0  ;;  %v1269_v35 = vmul.f32 %v3337_v54, %v1234_v49  ;;  %v4110_v40 = vmax.f32 %v3535_v9, 0.0 }
 0x4c9   :  { %v1362_v21 = vadd.f32 %v1361_v25, %v4106_v51  ;;  %v3544_v25 = vadd.f32 %v3346_v14, %v1267_v58  ;;  %v1270_v51 = vmul.f32 %v3337_v54, %v1235_v15  ;;  %v1238_v58 = vmul.f32 %v3328_v52, %v3301_v32 }
 0x4cb   :  { %v1363_v6 = vadd.f32 %v1362_v21, %v4107_v19  ;;  %v3553_v21 = vadd.f32 %v3346_v14, %v1268_v47  ;;  %v1271_v19 = vmul.f32 %v3337_v54, %v1236_v44  ;;  %v4111_v28 = vmax.f32 %v3544_v25, 0.0 }
 0x4cc   :  { %v1239_v47 = vmul.f32 %v3328_v52, %v3307_v50 }
 0x4cd   :  { %v1364_v60 = vadd.f32 %v1363_v6, %v4108_v12  ;;  %v3562_v6 = vadd.f32 %v3346_v14, %v1269_v35  ;;  %v1272_v12 = vmul.f32 %v3337_v54, %v1237_v62  ;;  %v4116_v32 = vmax.f32 %v3553_v21, 0.0 }
 0x4ce   :  { %v1240_v35 = vmul.f32 %v3328_v52, %v3313_v7 }
 0x4cf   :  { %v1365_v49 = vadd.f32 %v1364_v60, %v4109_v48  ;;  %v3571_v60 = vadd.f32 %v3346_v14, %v1270_v51  ;;  %v1273_v48 = vmul.f32 %v3337_v54, %v1238_v58  ;;  %v4112_v50 = vmax.f32 %v3562_v6, 0.0 }
 0x4d0   :  { %v1241_v51 = vmul.f32 %v3328_v52, %v3319_v13 }
 0x4d1   :  { %v1366_v15 = vadd.f32 %v1365_v49, %v4110_v40  ;;  %v3580_v49 = vadd.f32 %v3346_v14, %v1271_v19  ;;  %v1274_v40 = vmul.f32 %v3337_v54, %v1239_v47  ;;  %v4115_v7 = vmax.f32 %v3571_v60, 0.0 }
 0x4d2   :  { %v1275_v19 = vmul.f32 %v3337_v54, %v1240_v35  ;;  %v1276_v52 = vmul.f32 %v3337_v54, %v1241_v51 }
 0x4d3   :  { %v1367_v44 = vadd.f32 %v1366_v15, %v4111_v28  ;;  %v3589_v15 = vadd.f32 %v3346_v14, %v1272_v12  ;;  %v3596_v28 = vadd.f32 %v3346_v14, %v1273_v48  ;;  %v3603_v12 = vadd.f32 %v3346_v14, %v1274_v40 }
 0x4d4   :  { %v3609_v35 = vadd.f32 %v3346_v14, %v1275_v19 }
 0x4d5   :  { %v1368_v62 = vadd.f32 %v1367_v44, %v4116_v32  ;;  %v4113_v44 = vmax.f32 %v3580_v49, 0.0  ;;  %v4114_v47 = vmax.f32 %v3589_v15, 0.0  ;;  %v1340_v48 = vmax.f32 %v3596_v28, 0.0 }
 0x4d6   :  { %v1341_v54 = vmax.f32 %v3603_v12, 0.0  ;;  %v1342_v51 = vmax.f32 %v3609_v35, 0.0 }
 0x4d7   :  { %v1369_v58 = vadd.f32 %v1368_v62, %v4112_v50 }
 0x4d9   :  { %v1370_v13 = vadd.f32 %v1369_v58, %v4115_v7  ;;  %v3615_v58 = vadd.f32 %v3346_v14, %v1276_v52 }
 0x4db   :  { %v1371_v62 = vadd.f32 %v1370_v13, %v4113_v44  ;;  %v1343_v19 = vmax.f32 %v3615_v58, 0.0 }
 0x4dd   :  { %v1372_v50 = vadd.f32 %v1371_v62, %v4114_v47 }
 0x4df   :  { %v1373_v40 = vadd.f32 %v1372_v50, %v1340_v48 }
 0x4e1   :  { %v1374_v13 = vadd.f32 %v1373_v40, %v1341_v54 }
 0x4e3   :  { %v1375_v44 = vadd.f32 %v1374_v13, %v1342_v51 }
 0x4e5   :  { %v1376_v62 = vadd.f32 %v1375_v44, %v1343_v19 }
 0x4e7   :  { %v1377_v14 = vrot.slane %v1376_v62, 4 }
 0x4e9   :  { %v1378_v52 = vadd.f32 %v1377_v14, %v1376_v62 }
 0x4eb   :  { %v1379_v47 = vrot.slane %v1378_v52, 2 }
 0x4ed   :  { %v1380_v7 = vadd.f32 %v1379_v47, %v1378_v52 }
 0x4ef   :  { %v1381_v32 = vrot.slane %v1380_v7, 1 }
 0x4f1   :  { %v1382_v0 = vadd.f32 %v1381_v32, %v1380_v7 }
 0x4f3   :  { %v3629_v50 = vmul.f32 %v1382_v0, %v2576_v36 }
 0x4f5   :  { %v3634_v40 = vsub.f32 %v1312_v5, %v3629_v50  ;;  %v3639_v13 = vsub.f32 %v1313_v3, %v3629_v50  ;;  %v3644_v44 = vsub.f32 %v1314_v11, %v3629_v50  ;;  %v3653_v38 = vsub.f32 %v1315_v57, %v3629_v50 }
 0x4f6   :  { %v3658_v10 = vsub.f32 %v1316_v16, %v3629_v50  ;;  %v3665_v3 = vsub.f32 %v1317_v55, %v3629_v50  ;;  %v3672_v57 = vsub.f32 %v1318_v20, %v3629_v50  ;;  %v3679_v7 = vsub.f32 %v1319_v29, %v3629_v50 }
 0x4f7   :  { %v1416_v32 = vmul.f32 %v3634_v40, %v3634_v40  ;;  %v1417_v0 = vmul.f32 %v3639_v13, %v3639_v13  ;;  %v1418_v43 = vmul.f32 %v3644_v44, %v3644_v44  ;;  %v1419_v11 = vmul.f32 %v3653_v38, %v3653_v38 }
 0x4f8   :  { %v1420_v1 = vmul.f32 %v3658_v10, %v3658_v10  ;;  %v1421_v45 = vmul.f32 %v3665_v3, %v3665_v3  ;;  %v3686_v47 = vsub.f32 %v1320_v46, %v3629_v50  ;;  %v1422_v39 = vmul.f32 %v3672_v57, %v3672_v57 }
 0x4f9   :  { %v1448_v5 = vadd.f32 %v1417_v0, %v1416_v32  ;;  %v3693_v62 = vsub.f32 %v1321_v26, %v3629_v50  ;;  %v1423_v59 = vmul.f32 %v3679_v7, %v3679_v7  ;;  %v3700_v14 = vsub.f32 %v1322_v56, %v3629_v50 }
 0x4fa   :  { %v1424_v53 = vmul.f32 %v3686_v47, %v3686_v47  ;;  %v3707_v52 = vsub.f32 %v1323_v33, %v3629_v50  ;;  %v3714_v32 = vsub.f32 %v1324_v41, %v3629_v50  ;;  %v3721_v0 = vsub.f32 %v1325_v4, %v3629_v50 }
 0x4fb   :  { %v1449_v61 = vadd.f32 %v1448_v5, %v1418_v43  ;;  %v1425_v23 = vmul.f32 %v3693_v62, %v3693_v62  ;;  %v1426_v27 = vmul.f32 %v3700_v14, %v3700_v14  ;;  %v3728_v43 = vsub.f32 %v1326_v22, %v3629_v50 }
 0x4fc   :  { %v1427_v42 = vmul.f32 %v3707_v52, %v3707_v52  ;;  %v1428_v31 = vmul.f32 %v3714_v32, %v3714_v32  ;;  %v3735_v5 = vsub.f32 %v1327_v8, %v3629_v50  ;;  %v1429_v63 = vmul.f32 %v3721_v0, %v3721_v0 }
 0x4fd   :  { %v1450_v16 = vadd.f32 %v1449_v61, %v1419_v11  ;;  %v4118_v11 = vmax.f32 %v3490_v37, 0.0  ;;  %v1430_v24 = vmul.f32 %v3728_v43, %v3728_v43 }
 0x4fe   :  { %v1431_v18 = vmul.f32 %v3735_v5, %v3735_v5 }
 0x4ff   :  { %v1451_v55 = vadd.f32 %v1450_v16, %v1420_v1  ;;  %v3742_v61 = vsub.f32 %v4118_v11, %v3629_v50  ;;  %v4119_v1 = vmax.f32 %v3499_v30, 0.0  ;;  %v4126_v11 = vmax.f32 %v3562_v6, 0.0 }
 0x501   :  { %v1452_v20 = vadd.f32 %v1451_v55, %v1421_v45  ;;  %v3749_v16 = vsub.f32 %v4119_v1, %v3629_v50  ;;  %v4120_v45 = vmax.f32 %v3508_v2, 0.0  ;;  %v1432_v37 = vmul.f32 %v3742_v61, %v3742_v61 }
 0x502   :  { %v4127_v1 = vmax.f32 %v3571_v60, 0.0 }
 0x503   :  { %v1453_v29 = vadd.f32 %v1452_v20, %v1422_v39  ;;  %v3756_v55 = vsub.f32 %v4120_v45, %v3629_v50  ;;  %v4121_v20 = vmax.f32 %v3517_v17, 0.0  ;;  %v1433_v30 = vmul.f32 %v3749_v16, %v3749_v16 }
 0x504   :  { %v4128_v45 = vmax.f32 %v3580_v49, 0.0 }
 0x505   :  { %v1454_v46 = vadd.f32 %v1453_v29, %v1423_v59  ;;  %v3763_v59 = vsub.f32 %v4121_v20, %v3629_v50  ;;  %v1434_v2 = vmul.f32 %v3756_v55, %v3756_v55  ;;  %v4129_v20 = vmax.f32 %v3589_v15, 0.0 }
 0x507   :  { %v1455_v26 = vadd.f32 %v1454_v46, %v1424_v53  ;;  %v4122_v53 = vmax.f32 %v3526_v34, 0.0  ;;  %v1435_v17 = vmul.f32 %v3763_v59, %v3763_v59 }
 0x509   :  { %v1456_v56 = vadd.f32 %v1455_v26, %v1425_v23  ;;  %v3770_v46 = vsub.f32 %v4122_v53, %v3629_v50  ;;  %v4123_v26 = vmax.f32 %v3535_v9, 0.0  ;;  %v3826_v53 = vsub.f32 %v1340_v48, %v3629_v50 }
 0x50b   :  { %v1457_v33 = vadd.f32 %v1456_v56, %v1426_v27  ;;  %v3777_v27 = vsub.f32 %v4123_v26, %v3629_v50  ;;  %v1436_v34 = vmul.f32 %v3770_v46, %v3770_v46  ;;  %v1444_v28 = vmul.f32 %v3826_v53, %v3826_v53 }
 0x50d   :  { %v1458_v41 = vadd.f32 %v1457_v33, %v1427_v42  ;;  %v4124_v42 = vmax.f32 %v3544_v25, 0.0  ;;  %v1437_v9 = vmul.f32 %v3777_v27, %v3777_v27 }
 0x50f   :  { %v1459_v4 = vadd.f32 %v1458_v41, %v1428_v31  ;;  %v3784_v33 = vsub.f32 %v4124_v42, %v3629_v50  ;;  %v4125_v41 = vmax.f32 %v3553_v21, 0.0 }
 0x511   :  { %v1460_v22 = vadd.f32 %v1459_v4, %v1429_v63  ;;  %v3791_v63 = vsub.f32 %v4125_v41, %v3629_v50  ;;  %v1438_v25 = vmul.f32 %v3784_v33, %v3784_v33 }
 0x513   :  { %v1461_v8 = vadd.f32 %v1460_v22, %v1430_v24  ;;  %v3798_v24 = vsub.f32 %v4126_v11, %v3629_v50  ;;  %v1439_v21 = vmul.f32 %v3791_v63, %v3791_v63 }
 0x515   :  { %v1462_v39 = vadd.f32 %v1461_v8, %v1431_v18  ;;  %v3805_v18 = vsub.f32 %v4127_v1, %v3629_v50  ;;  %v1440_v6 = vmul.f32 %v3798_v24, %v3798_v24 }
 0x517   :  { %v1463_v29 = vadd.f32 %v1462_v39, %v1432_v37  ;;  %v3812_v37 = vsub.f32 %v4128_v45, %v3629_v50  ;;  %v1441_v60 = vmul.f32 %v3805_v18, %v3805_v18 }
 0x519   :  { %v1464_v23 = vadd.f32 %v1463_v29, %v1433_v30  ;;  %v3819_v30 = vsub.f32 %v4129_v20, %v3629_v50  ;;  %v1442_v49 = vmul.f32 %v3812_v37, %v3812_v37 }
 0x51b   :  { %v1465_v56 = vadd.f32 %v1464_v23, %v1434_v2  ;;  %v3833_v23 = vsub.f32 %v1341_v54, %v3629_v50  ;;  %v1443_v15 = vmul.f32 %v3819_v30, %v3819_v30 }
 0x51d   :  { %v1466_v31 = vadd.f32 %v1465_v56, %v1435_v17  ;;  %v3840_v17 = vsub.f32 %v1342_v51, %v3629_v50  ;;  %v3847_v56 = vsub.f32 %v1343_v19, %v3629_v50  ;;  %v1445_v12 = vmul.f32 %v3833_v23, %v3833_v23 }
 0x51f   :  { %v1467_v4 = vadd.f32 %v1466_v31, %v1436_v34  ;;  %v1446_v42 = vmul.f32 %v3840_v17, %v3840_v17  ;;  %v1447_v35 = vmul.f32 %v3847_v56, %v3847_v56 }
 0x521   :  { %v1468_v22 = vadd.f32 %v1467_v4, %v1437_v9 }
 0x523   :  { %v1469_v8 = vadd.f32 %v1468_v22, %v1438_v25 }
 0x525   :  { %v1470_v39 = vadd.f32 %v1469_v8, %v1439_v21 }
 0x527   :  { %v1471_v29 = vadd.f32 %v1470_v39, %v1440_v6 }
 0x529   :  { %v1472_v2 = vadd.f32 %v1471_v29, %v1441_v60  ;;  %v3867_v29 = vld [vmem:[%s4103_s11] ss:$0 sm:$0xff] }
 0x52b   :  { %v1473_v26 = vadd.f32 %v1472_v2, %v1442_v49 }
 0x52d   :  { %v1474_v48 = vadd.f32 %v1473_v26, %v1443_v15 }
 0x52f   :  { %v1475_v54 = vadd.f32 %v1474_v48, %v1444_v28  ;;  %v3883_v28 = vld [vmem:[%s4104_s12] ss:$0 sm:$0xff] }
 0x531   :  { %v1476_v34 = vadd.f32 %v1475_v54, %v1445_v12 }
 0x533   :  { %v1477_v51 = vadd.f32 %v1476_v34, %v1446_v42 }
 0x535   :  { %v1478_v31 = vadd.f32 %v1477_v51, %v1447_v35 }
 0x537   :  { %v1479_v41 = vrot.slane %v1478_v31, 4 }
 0x539   :  { %v1480_v9 = vadd.f32 %v1479_v41, %v1478_v31 }
 0x53b   :  { %v1481_v4 = vrot.slane %v1480_v9, 2 }
 0x53d   :  { %v1482_v11 = vadd.f32 %v1481_v4, %v1480_v9 }
 0x53f   :  { %v1483_v58 = vrot.slane %v1482_v11, 1 }
 0x541   :  { %v1484_v19 = vadd.f32 %v1483_v58, %v1482_v11 }
 0x543   :  { %v1485_v50 = vmul.f32 %v1484_v19, %v2576_v36 }
 0x545   :  { %v1486_v25 = vadd.f32 1e-05, %v1485_v50 }
 0x547   :  { %1842 = vrsqrt.f32 %v1486_v25  ;;  %vm1493_vm8 = vweird.f32 %v1486_v25 }
 0x54d   :  { %v1843_v22 = vpop.eup %1842 }
 0x54e   :  { %v1488_v1 = vmul.f32 %v1843_v22, %v1486_v25  ;;  %vm1494_vm7 = vweird.f32 %v1843_v22 }
 0x54f   :  { %vm1495_vm9 = vmor %vm1493_vm8, %vm1494_vm7 }
 0x550   :  { %v1489_v21 = vmul.f32 %v1843_v22, %v1488_v1 }
 0x552   :  { %v1490_v8 = vmul.f32 0.5, %v1489_v21 }
 0x554   :  { %v1491_v45 = vsub.f32 1.5, %v1490_v8 }
 0x556   :  { %v1492_v6 = vmul.f32 %v1843_v22, %v1491_v45 }
 0x558   :  { %v3856_v39 = vsel %vm1495_vm9, %v1843_v22, %v1492_v6 }
 0x559   :  { %v1497_v20 = vmul.f32 %v3856_v39, %v3634_v40  ;;  %v1498_v60 = vmul.f32 %v3856_v39, %v3639_v13  ;;  %v1499_v36 = vmul.f32 %v3856_v39, %v3644_v44  ;;  %v1500_v49 = vmul.f32 %v3856_v39, %v3653_v38 }
 0x55a   :  { %v1501_v2 = vmul.f32 %v3856_v39, %v3658_v10  ;;  %v1502_v40 = vmul.f32 %v3856_v39, %v3665_v3  ;;  %v1503_v13 = vmul.f32 %v3856_v39, %v3672_v57  ;;  %v1504_v38 = vmul.f32 %v3856_v39, %v3679_v7 }
 0x55b   :  { %v1532_v15 = vmul.f32 %v3867_v29, %v1497_v20  ;;  %v1533_v44 = vmul.f32 %v3867_v29, %v1498_v60  ;;  %v1534_v26 = vmul.f32 %v3867_v29, %v1499_v36  ;;  %v1535_v10 = vmul.f32 %v3867_v29, %v1500_v49 }
 0x55c   :  { %v1505_v3 = vmul.f32 %v3856_v39, %v3686_v47  ;;  %v1536_v57 = vmul.f32 %v3867_v29, %v1501_v2  ;;  %v1506_v48 = vmul.f32 %v3856_v39, %v3693_v62  ;;  %v1507_v12 = vmul.f32 %v3856_v39, %v3700_v14 }
 0x55d   :  { %v1537_v54 = vmul.f32 %v3867_v29, %v1502_v40  ;;  %v1538_v42 = vmul.f32 %v3867_v29, %v1503_v13  ;;  %v1567_v34 = vadd.f32 %v3883_v28, %v1532_v15  ;;  %v1568_v7 = vadd.f32 %v3883_v28, %v1533_v44 }
 0x55e   :  { %v1569_v35 = vadd.f32 %v3883_v28, %v1534_v26  ;;  %v1508_v47 = vmul.f32 %v3856_v39, %v3707_v52  ;;  %v1539_v51 = vmul.f32 %v3867_v29, %v1504_v38  ;;  %v1570_v62 = vadd.f32 %v3883_v28, %v1535_v10 }
 0x55f   :  { %v1509_v14 = vmul.f32 %v3856_v39, %v3714_v32  ;;  %v1510_v31 = vmul.f32 %v3856_v39, %v3721_v0  ;;  %v1540_v41 = vmul.f32 %v3867_v29, %v1505_v3  ;;  %v1571_v9 = vadd.f32 %v3883_v28, %v1536_v57 }
 0x560   :  { %v1511_v4 = vmul.f32 %v3856_v39, %v3728_v43  ;;  %v1541_v11 = vmul.f32 %v3867_v29, %v1506_v48  ;;  %v1542_v52 = vmul.f32 %v3867_v29, %v1507_v12  ;;  %v1572_v58 = vadd.f32 %v3883_v28, %v1537_v54 }
 0x561   :  { %v1573_v19 = vadd.f32 %v3883_v28, %v1538_v42  ;;  %v1599_v50 = vmax.f32 %v1567_v34, 0.0  ;;  %v1600_v32 = vmax.f32 %v1568_v7, 0.0  ;;  %v1601_v25 = vmax.f32 %v1569_v35, 0.0 }
 0x562   :  { %v1512_v0 = vmul.f32 %v3856_v39, %v3735_v5  ;;  %v1543_v22 = vmul.f32 %v3867_v29, %v1508_v47  ;;  %v1574_v1 = vadd.f32 %v3883_v28, %v1539_v51  ;;  %v1602_v21 = vmax.f32 %v1570_v62, 0.0 }
 0x563   :  { %v1513_v43 = vmul.f32 %v3856_v39, %v3742_v61  ;;  %v1544_v8 = vmul.f32 %v3867_v29, %v1509_v14  ;;  %v1575_v45 = vadd.f32 %v3883_v28, %v1540_v41  ;;  %v1603_v6 = vmax.f32 %v1571_v9, 0.0  ;;  %1631 = vst [vmem:[%s4105_s13] sm:$0xff] %v1599_v50 }
 0x564   :  { %v1514_v5 = vmul.f32 %v3856_v39, %v3749_v16  ;;  %v1545_v20 = vmul.f32 %v3867_v29, %v1510_v31  ;;  %v1576_v60 = vadd.f32 %v3883_v28, %v1541_v11  ;;  %v1604_v36 = vmax.f32 %v1572_v58, 0.0  ;;  %1632 = vst [vmem:[%s4105_s13 + $0x8] sm:$0xff] %v1600_v32 }
 0x565   :  { %v1515_v61 = vmul.f32 %v3856_v39, %v3756_v55  ;;  %v1546_v49 = vmul.f32 %v3867_v29, %v1511_v4  ;;  %v1577_v2 = vadd.f32 %v3883_v28, %v1542_v52  ;;  %v1605_v40 = vmax.f32 %v1573_v19, 0.0  ;;  %1633 = vst [vmem:[%s4105_s13 + $0x10] sm:$0xff] %v1601_v25 }
 0x566   :  { %v1516_v16 = vmul.f32 %v3856_v39, %v3763_v59  ;;  %v1547_v13 = vmul.f32 %v3867_v29, %v1512_v0  ;;  %v1578_v15 = vadd.f32 %v3883_v28, %v1543_v22  ;;  %v1606_v44 = vmax.f32 %v1574_v1, 0.0  ;;  %1634 = vst [vmem:[%s4105_s13 + $0x18] sm:$0xff] %v1602_v21 }
 0x567   :  { %v1517_v55 = vmul.f32 %v3856_v39, %v3770_v46  ;;  %v1548_v26 = vmul.f32 %v3867_v29, %v1513_v43  ;;  %v1579_v38 = vadd.f32 %v3883_v28, %v1544_v8  ;;  %v1607_v10 = vmax.f32 %v1575_v45, 0.0  ;;  %1635 = vst [vmem:[%s4105_s13 + $0x20] sm:$0xff] %v1603_v6 }
 0x568   :  { %v1518_v59 = vmul.f32 %v3856_v39, %v3777_v27  ;;  %v1549_v3 = vmul.f32 %v3867_v29, %v1514_v5  ;;  %v1580_v57 = vadd.f32 %v3883_v28, %v1545_v20  ;;  %v1608_v48 = vmax.f32 %v1576_v60, 0.0  ;;  %1636 = vst [vmem:[%s4105_s13 + $0x28] sm:$0xff] %v1604_v36 }
 0x569   :  { %v1519_v46 = vmul.f32 %v3856_v39, %v3784_v33  ;;  %v1550_v12 = vmul.f32 %v3867_v29, %v1515_v61  ;;  %v1581_v54 = vadd.f32 %v3883_v28, %v1546_v49  ;;  %v1609_v42 = vmax.f32 %v1577_v2, 0.0  ;;  %1637 = vst [vmem:[%s4105_s13 + $0x30] sm:$0xff] %v1605_v40 }
 0x56a   :  { %v1520_v27 = vmul.f32 %v3856_v39, %v3791_v63  ;;  %v1551_v34 = vmul.f32 %v3867_v29, %v1516_v16  ;;  %v1582_v7 = vadd.f32 %v3883_v28, %v1547_v13  ;;  %v1610_v35 = vmax.f32 %v1578_v15, 0.0  ;;  %1638 = vst [vmem:[%s4105_s13 + $0x38] sm:$0xff] %v1606_v44 }
 0x56b   :  { %v1521_v33 = vmul.f32 %v3856_v39, %v3798_v24  ;;  %v1552_v47 = vmul.f32 %v3867_v29, %v1517_v55  ;;  %v1583_v51 = vadd.f32 %v3883_v28, %v1548_v26  ;;  %v1611_v62 = vmax.f32 %v1579_v38, 0.0  ;;  %1639 = vst [vmem:[%s4105_s13 + $0x40] sm:$0xff] %v1607_v10 }
 0x56c   :  { %v1522_v63 = vmul.f32 %v3856_v39, %v3805_v18  ;;  %v1553_v14 = vmul.f32 %v3867_v29, %v1518_v59  ;;  %v1584_v31 = vadd.f32 %v3883_v28, %v1549_v3  ;;  %v1612_v41 = vmax.f32 %v1580_v57, 0.0  ;;  %1640 = vst [vmem:[%s4105_s13 + $0x48] sm:$0xff] %v1608_v48 }
 0x56d   :  { %v1523_v24 = vmul.f32 %v3856_v39, %v3812_v37  ;;  %v1554_v9 = vmul.f32 %v3867_v29, %v1519_v46  ;;  %v1585_v4 = vadd.f32 %v3883_v28, %v1550_v12  ;;  %v1613_v11 = vmax.f32 %v1581_v54, 0.0  ;;  %1641 = vst [vmem:[%s4105_s13 + $0x50] sm:$0xff] %v1609_v42 }
 0x56e   :  { %v1524_v18 = vmul.f32 %v3856_v39, %v3819_v30  ;;  %v1555_v52 = vmul.f32 %v3867_v29, %v1520_v27  ;;  %v1586_v58 = vadd.f32 %v3883_v28, %v1551_v34  ;;  %v1614_v19 = vmax.f32 %v1582_v7, 0.0  ;;  %1642 = vst [vmem:[%s4105_s13 + $0x58] sm:$0xff] %v1610_v35 }
 0x56f   :  { %v1525_v37 = vmul.f32 %v3856_v39, %v3826_v53  ;;  %v1556_v50 = vmul.f32 %v3867_v29, %v1521_v33  ;;  %v1587_v32 = vadd.f32 %v3883_v28, %v1552_v47  ;;  %v1615_v25 = vmax.f32 %v1583_v51, 0.0  ;;  %1643 = vst [vmem:[%s4105_s13 + $0x60] sm:$0xff] %v1611_v62 }
 0x570   :  { %v1526_v30 = vmul.f32 %v3856_v39, %v3833_v23  ;;  %v1557_v0 = vmul.f32 %v3867_v29, %v1522_v63  ;;  %v1588_v22 = vadd.f32 %v3883_v28, %v1553_v14  ;;  %v1616_v1 = vmax.f32 %v1584_v31, 0.0  ;;  %1644 = vst [vmem:[%s4105_s13 + $0x68] sm:$0xff] %v1612_v41 }
 0x571   :  { %v1527_v53 = vmul.f32 %v3856_v39, %v3840_v17  ;;  %v1558_v21 = vmul.f32 %v3867_v29, %v1523_v24  ;;  %v1589_v43 = vadd.f32 %v3883_v28, %v1554_v9  ;;  %v1617_v8 = vmax.f32 %v1585_v4, 0.0  ;;  %1645 = vst [vmem:[%s4105_s13 + $0x70] sm:$0xff] %v1613_v11 }
 0x572   :  { %v1528_v23 = vmul.f32 %v3856_v39, %v3847_v56  ;;  %v1559_v45 = vmul.f32 %v3867_v29, %v1524_v18  ;;  %v1590_v6 = vadd.f32 %v3883_v28, %v1555_v52  ;;  %v1618_v5 = vmax.f32 %v1586_v58, 0.0  ;;  %1646 = vst [vmem:[%s4105_s13 + $0x78] sm:$0xff] %v1614_v19 }
 0x573   :  { %v1560_v17 = vmul.f32 %v3867_v29, %v1525_v37  ;;  %v1591_v20 = vadd.f32 %v3883_v28, %v1556_v50  ;;  %v1619_v60 = vmax.f32 %v1587_v32, 0.0  ;;  %1647 = vst [vmem:[%s4105_s13 + $0x80] sm:$0xff] %v1615_v25  ;;  %v1561_v56 = vmul.f32 %v3867_v29, %v1526_v30 }
 0x574   :  { %v1592_v39 = vadd.f32 %v3883_v28, %v1557_v0  ;;  %v1620_v36 = vmax.f32 %v1588_v22, 0.0  ;;  %1648 = vst [vmem:[%s4105_s13 + $0x88] sm:$0xff] %v1616_v1  ;;  %v1562_v61 = vmul.f32 %v3867_v29, %v1527_v53  ;;  %v1593_v49 = vadd.f32 %v3883_v28, %v1558_v21 }
 0x575   :  { %v1621_v2 = vmax.f32 %v1589_v43, 0.0  ;;  %1649 = vst [vmem:[%s4105_s13 + $0x90] sm:$0xff] %v1617_v8  ;;  %v1563_v40 = vmul.f32 %v3867_v29, %v1528_v23  ;;  %v1594_v16 = vadd.f32 %v3883_v28, %v1559_v45  ;;  %v1622_v13 = vmax.f32 %v1590_v6, 0.0 }
 0x576   :  { %1650 = vst [vmem:[%s4105_s13 + $0x98] sm:$0xff] %v1618_v5  ;;  %v1595_v15 = vadd.f32 %v3883_v28, %v1560_v17  ;;  %v1623_v44 = vmax.f32 %v1591_v20, 0.0  ;;  %v1596_v55 = vadd.f32 %v3883_v28, %v1561_v56  ;;  %v1624_v26 = vmax.f32 %v1592_v39, 0.0 }
 0x577   :  { %1651 = vst [vmem:[%s4105_s13 + $0xa0] sm:$0xff] %v1619_v60  ;;  %v1597_v29 = vadd.f32 %v3883_v28, %v1562_v61  ;;  %v1625_v38 = vmax.f32 %v1593_v49, 0.0  ;;  %v1598_v10 = vadd.f32 %v3883_v28, %v1563_v40  ;;  %v1626_v59 = vmax.f32 %v1594_v16, 0.0 }
 0x578   :  { %1652 = vst [vmem:[%s4105_s13 + $0xa8] sm:$0xff] %v1620_v36  ;;  %v1627_v3 = vmax.f32 %v1595_v15, 0.0  ;;  %v1628_v57 = vmax.f32 %v1596_v55, 0.0 }
 0x579   :  { %1653 = vst [vmem:[%s4105_s13 + $0xb0] sm:$0xff] %v1621_v2  ;;  %v1629_v48 = vmax.f32 %v1597_v29, 0.0  ;;  %v1630_v28 = vmax.f32 %v1598_v10, 0.0 }
 0x57a   :  { %1654 = vst [vmem:[%s4105_s13 + $0xb8] sm:$0xff] %v1622_v13 }
 0x57b   :  { %1655 = vst [vmem:[%s4105_s13 + $0xc0] sm:$0xff] %v1623_v44 }
 0x57c   :  { %1656 = vst [vmem:[%s4105_s13 + $0xc8] sm:$0xff] %v1624_v26 }
 0x57d   :  { %1657 = vst [vmem:[%s4105_s13 + $0xd0] sm:$0xff] %v1625_v38 }
 0x57e   :  { %1658 = vst [vmem:[%s4105_s13 + $0xd8] sm:$0xff] %v1626_v59 }
 0x57f   :  { %1659 = vst [vmem:[%s4105_s13 + $0xe0] sm:$0xff] %v1627_v3 }
 0x580   :  { %1660 = vst [vmem:[%s4105_s13 + $0xe8] sm:$0xff] %v1628_v57 }
 0x581   :  { %1661 = vst [vmem:[%s4105_s13 + $0xf0] sm:$0xff] %v1629_v48 }
 0x582   :  { %1662 = vst [vmem:[%s4105_s13 + $0xf8] sm:$0xff] %v1630_v28 }

</bundles_post_ra>
